<compile_context>
chip_gen: v5e
topology: v5e:2x2
jax: 0.10.0
libtpu: 0.0.40
codegen_flags: <defaults>
</compile_context>

<pallas_src>
import functools

import jax
import jax.numpy as jnp
from jax import lax
from jax.experimental import pallas as pl
from jax.experimental.pallas import tpu as pltpu


# ---------------------------------------------------------------------------
# Helpers
# ---------------------------------------------------------------------------
def _vmem_specs(n):
    return [pl.BlockSpec(memory_space=pltpu.MemorySpace.VMEM) for _ in range(n)]


_VMEM_OUT = pl.BlockSpec(memory_space=pltpu.MemorySpace.VMEM)


def _vmem_limit(est_bytes):
    # Default scoped VMEM is 16 MiB (v5e) / 32 MiB (v6e, v7x). Request what the kernel
    # needs (x2 slack for double-buffering), clamped so it stays valid on v7x (64 MiB).
    return int(min(64 * 1024 * 1024, max(32 * 1024 * 1024, 2 * est_bytes)))


# ---------------------------------------------------------------------------
# Kernel 1: fused MLP -> similarity -> per-row top-k neighbour indices
# ---------------------------------------------------------------------------
def _mlp_knn_kernel(x_rows_ref, x_full_ref, w1_ref, b1_ref, w2_ref, b2_ref,
                    nbr_ref, *, k):
    """Emit the (rows, k) nearest-neighbour index table for this row tile.

    Similarity s[i, j] = 2*z_i.z_j - ||z_j||^2 (row-constant ||z_i||^2 dropped: same
    per-row ordering; larger = closer, so it is top-k ready with no sign flip).
    Neighbour 0 is the node itself (loop=True); remaining k-1 picked by iterative max.
    """
    def mlp(x):
        h = jnp.dot(x, w1_ref[...], preferred_element_type=jnp.float32) + b1_ref[...]
        h = jnp.maximum(h, 0.0)                               # relu (dropout: identity)
        return jnp.dot(h.astype(w2_ref.dtype), w2_ref[...],
                       preferred_element_type=jnp.float32) + b2_ref[...]

    z_full = mlp(x_full_ref[...])                             # (N, H) f32, column side
    z_rows = mlp(x_rows_ref[...])                             # (R, H) f32, query side

    zb_full = z_full.astype(jnp.bfloat16)
    zb_rows = (2.0 * z_rows).astype(jnp.bfloat16)             # fold the 2 (exact)

    r, _ = z_rows.shape
    n, hdim = z_full.shape

    # 2*z_i.z_j on the MXU (contract feature dim of both operands, no transpose).
    g2 = lax.dot_general(zb_rows, zb_full, (((1,), (1,)), ((), ())),
                         preferred_element_type=jnp.float32)  # (R, N)
    # Column-norm row vector in (1, N) lane layout via a tiny MXU reduce (no XLU
    # transpose); squares from the bf16-rounded z for consistency with the Gram.
    zb32 = zb_full.astype(jnp.float32)
    ones = jnp.ones((1, hdim), jnp.float32)
    col_sq = lax.dot_general(ones, zb32 * zb32, (((1,), (1,)), ((), ())),
                             preferred_element_type=jnp.float32)  # (1, N)
    s = g2 - col_sq                                           # single N^2 VPU pass

    col_i = lax.broadcasted_iota(jnp.int32, (r, n), 1)
    col_f = col_i.astype(jnp.float32)

    # Self edge written directly (deterministic loop=True), then excluded.
    row0 = pl.program_id(0) * r
    self_i = row0 + lax.broadcasted_iota(jnp.int32, (r, 1), 0)
    nbr_ref[:, 0:1] = self_i
    s = jnp.where(col_i == self_i, -jnp.inf, s)

    big = jnp.float32(n)
    for j in range(1, k):                                     # k is tiny and static
        m = jnp.max(s, axis=1, keepdims=True)                 # (R, 1)
        idx_f = jnp.min(jnp.where(s == m, col_f, big), axis=1, keepdims=True)
        nbr_ref[:, j:j + 1] = idx_f.astype(jnp.int32)
        s = jnp.where(col_f == idx_f, -jnp.inf, s)            # drop selected column


def mlp_knn_forward(x, w1, b1, w2, b2, *, k):
    n, c = x.shape
    h1 = w1.shape[0]
    h2 = w2.shape[0]

    # Row grid over query nodes ("parallel" -> both TensorCores on v7x). At toy N it
    # degenerates to a single tile.
    tile = n if (n <= 512 or n % 512 != 0) else 512
    n_tiles = n // tile

    flops = (n_tiles * (2 * n * c * h1 + 2 * n * h1 * h2)     # column-side MLP per tile
             + 2 * n * c * h1 + 2 * n * h1 * h2               # query-side MLP total
             + 2 * n * n * h2                                 # Gram
             + 16 * n * n)                                    # top-k elementwise passes
    bytes_accessed = (n_tiles * (n * c * 2 + (c * h1 + h1 * h2) * 2 + (h1 + h2) * 4)
                      + n * c * 2 + n * k * 4)
    est_vmem = (3 * tile * n * 4 + 2 * n * h2 * 4 + 4 * n * c * 2
                + (c * h1 + h1 * h2) * 2 + (1 << 20))

    xb = x.astype(jnp.bfloat16)
    return pl.pallas_call(
        functools.partial(_mlp_knn_kernel, k=k),
        out_shape=jax.ShapeDtypeStruct((n, k), jnp.int32),
        grid=(n_tiles,),
        in_specs=[
            pl.BlockSpec((tile, c), lambda i: (i, 0)),        # query rows
            pl.BlockSpec((n, c), lambda i: (0, 0)),           # all nodes (Gram columns)
            pl.BlockSpec((c, h1), lambda i: (0, 0)),
            pl.BlockSpec((1, h1), lambda i: (0, 0)),
            pl.BlockSpec((h1, h2), lambda i: (0, 0)),
            pl.BlockSpec((1, h2), lambda i: (0, 0)),
        ],
        out_specs=pl.BlockSpec((tile, k), lambda i: (i, 0)),
        compiler_params=pltpu.CompilerParams(
            dimension_semantics=("parallel",),
            vmem_limit_bytes=_vmem_limit(est_vmem)),
        cost_estimate=pl.CostEstimate(flops=flops, transcendentals=0,
                                      bytes_accessed=bytes_accessed),
    )(
        xb, xb,
        w1.T.astype(jnp.bfloat16), b1.reshape(1, -1).astype(jnp.float32),
        w2.T.astype(jnp.bfloat16), b2.reshape(1, -1).astype(jnp.float32),
    )


# ---------------------------------------------------------------------------
# Kernel 2: fused dual GCN encoder (A_norm built in-kernel from the kNN table)
# ---------------------------------------------------------------------------
def _dual_gcn_kernel(nbr_ref, wgt_ref, x_ref, mask_ref, wm1_ref, wr1_ref,
                     b1_ref, w2_ref, b2_ref, o_ref, h_buf, *, k):
    n = x_ref.shape[0]
    h = wm1_ref.shape[1]

    # Normalized dense adjacency A[tgt, src] = w built in VMEM from the (N, k) table:
    # no XLA scatter on the critical path and no N^2 HBM round-trip for A_norm.
    col = lax.broadcasted_iota(jnp.int32, (n, n), 1)
    a = jnp.zeros((n, n), jnp.float32)
    for j in range(k):                                        # k is tiny and static
        a = a + jnp.where(col == nbr_ref[:, j:j + 1], wgt_ref[:, j:j + 1], 0.0)
    a = a.astype(jnp.bfloat16)                                # single cast, MXU operand

    x = x_ref[...]                                            # bf16 (N, C)
    xm = (x.astype(jnp.float32) * (1.0 - mask_ref[...])).astype(jnp.bfloat16)  # noise='mask'

    # Layer 1: two narrow X @ W dots (no block-diag zero-FLOP waste); hidden packed into
    # one buffer so the A_norm aggregation runs exactly once at double lane width.
    h_buf[:, :h] = jnp.dot(x, wm1_ref[...], preferred_element_type=jnp.float32)
    h_buf[:, h:] = jnp.dot(xm, wr1_ref[...], preferred_element_type=jnp.float32)
    hid = jnp.dot(a, h_buf[...].astype(jnp.bfloat16), preferred_element_type=jnp.float32)
    hid = jnp.maximum(hid + b1_ref[...], 0.0)                 # GCNConv bias, then relu

    # Layer 2: block-diagonal weights zero-padded to 128 lanes -> lane-dense store.
    g = jnp.dot(hid.astype(w2_ref.dtype), w2_ref[...], preferred_element_type=jnp.float32)
    o_ref[...] = jnp.dot(a, g.astype(jnp.bfloat16),
                         preferred_element_type=jnp.float32) + b2_ref[...]


def dual_gcn_forward(nbr, wgt, features, mask, main_params, rec_params, *, k):
    wm1, bm1, wm2, bm2 = main_params
    wr1, br1, wr2, br2 = rec_params
    n, c = features.shape
    hm, hr = wm1.shape[0], wr1.shape[0]
    om, orr = wm2.shape[0], wr2.shape[0]
    out_w = om + orr
    pad_w = max(128, ((out_w + 127) // 128) * 128)            # lane-dense output width

    # One-time (constant-foldable for fixed params) packing outside the kernel.
    w2 = jax.scipy.linalg.block_diag(wm2.T, wr2.T)            # (hm+hr, out_w)
    w2 = jnp.pad(w2, ((0, 0), (0, pad_w - out_w))).astype(jnp.bfloat16)
    b1 = jnp.concatenate([bm1, br1]).reshape(1, -1).astype(jnp.float32)
    b2 = jnp.pad(jnp.concatenate([bm2, br2]),
                 (0, pad_w - out_w)).reshape(1, -1).astype(jnp.float32)

    hh = hm + hr
    flops = (3 * k * n * n + 2 * n * c * hh + 2 * n * n * hh
             + 2 * n * hh * pad_w + 2 * n * n * pad_w)
    bytes_accessed = (n * k * 8 + n * c * 6 + (c * hh + hh * pad_w) * 2
                      + (hh + pad_w) * 4 + n * pad_w * 4)
    est_vmem = n * n * 6 + n * pad_w * 8 + n * hh * 4 + n * c * 8 + (1 << 20)

    # TODO(synk): at realistic N, split the two layers into row-gridded launches (layer 2
    #             needs all-node layer-1 output) and use a k-sparse gather aggregation.
    out = pl.pallas_call(
        functools.partial(_dual_gcn_kernel, k=k),
        out_shape=jax.ShapeDtypeStruct((n, pad_w), jnp.float32),
        in_specs=_vmem_specs(9),
        out_specs=_VMEM_OUT,
        scratch_shapes=[pltpu.VMEM((n, hh), jnp.float32)],
        compiler_params=pltpu.CompilerParams(vmem_limit_bytes=_vmem_limit(est_vmem)),
        cost_estimate=pl.CostEstimate(flops=flops, transcendentals=0,
                                      bytes_accessed=bytes_accessed),
    )(
        nbr, wgt.astype(jnp.float32),
        features.astype(jnp.bfloat16), mask.astype(jnp.float32),
        wm1.T.astype(jnp.bfloat16), wr1.T.astype(jnp.bfloat16),
        b1, w2, b2,
    )
    return out[:, :om], out[:, om:out_w]


# ---------------------------------------------------------------------------
# Graph glue (plain JAX, tiny O(N*k) work; no dense scatter anywhere)
# ---------------------------------------------------------------------------
def gcn_norm_from_knn(nbr):
    n, k = nbr.shape
    src = nbr.reshape(-1).astype(jnp.int32)                   # neighbours (sources)
    tgt = jnp.repeat(jnp.arange(n, dtype=jnp.int32), k)       # each node as target
    edge_index = jnp.stack([src, tgt], axis=0)                # (2, N*k)
    # gcn_norm(add_self_loops=False): deg = sum of unit edge weights over targets.
    # Each node is target exactly k consecutive times, so the scatter-add is a row-sum.
    deg = jnp.sum(jnp.ones((n, k), jnp.float32), axis=1)
    dinv = jnp.where(deg > 0, jax.lax.rsqrt(deg), 0.0)
    edge_weight = dinv[src] * dinv[tgt]                       # (N*k,)
    return edge_index, edge_weight, edge_weight.reshape(n, k)


# ---------------------------------------------------------------------------
# Full module forward
# ---------------------------------------------------------------------------
def mlp_knn_gnn_featrec_forward(features, mask, params, *, k):
    # Fused MLP + similarity + in-kernel top-k (embedding and distances never leave VMEM).
    nbr = mlp_knn_forward(features, *params["mlp"], k=k)      # (N, k) int32
    edge_index, edge_weight, wgt = gcn_norm_from_knn(nbr)
    # Fused dual GCN encoder (masking fused, A_norm built in-kernel, shared aggregation).
    x, x_rec = dual_gcn_forward(nbr, wgt, features, mask,
                                params["gnn_main"], params["gnn_rec"], k=k)
    return x, x_rec, edge_index, edge_weight


# ---------------------------------------------------------------------------
# Deterministic parameter init (PyTorch nn.Linear-style uniform)
# ---------------------------------------------------------------------------
def init_linear(key, out_c, in_c):
    kw, kb = jax.random.split(key)
    lim = 1.0 / jnp.sqrt(jnp.float32(in_c))
    w = jax.random.uniform(kw, (out_c, in_c), jnp.float32, -lim, lim)
    b = jax.random.uniform(kb, (out_c,), jnp.float32, -lim, lim)
    return w, b


if __name__ == "__main__":
    N, C, K, OUT = 32, 16, 4, 1          # nodes, in_channels, knn_k, out_channels

    key = jax.random.PRNGKey(0)
    ks = jax.random.split(key, 10)
    features = jax.random.normal(ks[0], (N, C), jnp.float32)
    mask = (jax.random.uniform(ks[1], (N, C)) < 0.3).astype(jnp.float32)

    # MLP (mlp_layers=2, hid=in): Linear(C,C) -> relu -> Linear(C,C)
    w1, b1 = init_linear(ks[2], C, C)
    w2, b2 = init_linear(ks[3], C, C)
    # gnn_main (gnn_layers=2, hid=in, out=1): GCNConv(C,C) -> relu -> GCNConv(C,1)
    wm1, bm1 = init_linear(ks[4], C, C)
    wm2, bm2 = init_linear(ks[5], OUT, C)
    # gnn_rec  (out=in_channels): GCNConv(C,C) -> relu -> GCNConv(C,C)
    wr1, br1 = init_linear(ks[6], C, C)
    wr2, br2 = init_linear(ks[7], C, C)

    params = {
        "mlp": (w1, b1, w2, b2),
        "gnn_main": (wm1, bm1, wm2, bm2),
        "gnn_rec": (wr1, br1, wr2, br2),
    }

    fwd = jax.jit(functools.partial(mlp_knn_gnn_featrec_forward, k=K))
    x, x_rec, edge_index, edge_weight = fwd(features, mask, params)
    jax.block_until_ready((x, x_rec, edge_index, edge_weight))

    assert x.shape == (N, OUT)
    assert x_rec.shape == (N, C)
    assert edge_index.shape == (2, N * K)
    assert edge_weight.shape == (N * K,)
    # loop=True: the first neighbour of every node is itself by construction.
    assert bool(jnp.all(edge_index[0].reshape(N, K)[:, 0] ==
                        jnp.arange(N, dtype=jnp.int32)))
    print("KERNEL_OK")
</pallas_src>

<mosaic_0001>
module attributes {stable_mosaic.version = 11 : i64} {
  func.func @_mlp_knn_kernel(%arg0: i32, %arg1: memref<32x16xbf16, #tpu.memory_space<vmem>>, %arg2: memref<32x16xbf16, #tpu.memory_space<vmem>>, %arg3: memref<16x16xbf16, #tpu.memory_space<vmem>>, %arg4: memref<1x16xf32, #tpu.memory_space<vmem>>, %arg5: memref<16x16xbf16, #tpu.memory_space<vmem>>, %arg6: memref<1x16xf32, #tpu.memory_space<vmem>>, %arg7: memref<32x4xi32, #tpu.memory_space<vmem>>) attributes {dimension_semantics = [#tpu.dimension_semantics<parallel>], iteration_bounds = array<i64: 1>, scalar_prefetch = 0 : i64, scratch_operands = 0 : i64, tpu.core_type = #tpu.core_type<tc>, window_params = [{transform_indices = @transform_0, window_bounds = array<i64: 32, 16>}, {pipeline_mode = #tpu.pipeline_mode<synchronous>, transform_indices = @transform_1, window_bounds = array<i64: 32, 16>}, {pipeline_mode = #tpu.pipeline_mode<synchronous>, transform_indices = @transform_2, window_bounds = array<i64: 16, 16>}, {pipeline_mode = #tpu.pipeline_mode<synchronous>, transform_indices = @transform_3, window_bounds = array<i64: 1, 16>}, {pipeline_mode = #tpu.pipeline_mode<synchronous>, transform_indices = @transform_4, window_bounds = array<i64: 16, 16>}, {pipeline_mode = #tpu.pipeline_mode<synchronous>, transform_indices = @transform_5, window_bounds = array<i64: 1, 16>}, {transform_indices = @transform_6, window_bounds = array<i64: 32, 4>}]} {
    %c0 = arith.constant 0 : index
    %c0_0 = arith.constant 0 : index
    %0 = vector.load %arg2[%c0, %c0_0] : memref<32x16xbf16, #tpu.memory_space<vmem>>, vector<32x16xbf16>
    %c0_1 = arith.constant 0 : index
    %c0_2 = arith.constant 0 : index
    %1 = vector.load %arg3[%c0_1, %c0_2] : memref<16x16xbf16, #tpu.memory_space<vmem>>, vector<16x16xbf16>
    %cst = arith.constant dense<0.000000e+00> : vector<32x16xf32>
    %2 = tpu.matmul %0, %1, %cst {dimension_numbers = #tpu.dot_dimension_numbers<[1], [0], [0], [1], [0, 0, 1, 1], [], []>} : vector<32x16xbf16>, vector<16x16xbf16>, vector<32x16xf32> -> vector<32x16xf32>
    %c0_3 = arith.constant 0 : index
    %c0_4 = arith.constant 0 : index
    %3 = vector.load %arg4[%c0_3, %c0_4] : memref<1x16xf32, #tpu.memory_space<vmem>>, vector<1x16xf32>
    %4 = vector.broadcast %3 : vector<1x16xf32> to vector<32x16xf32>
    %5 = arith.addf %2, %4 : vector<32x16xf32>
    %cst_5 = arith.constant 0.000000e+00 : f32
    %6 = vector.broadcast %cst_5 : f32 to vector<32x16xf32>
    %7 = arith.maximumf %5, %6 : vector<32x16xf32>
    %8 = arith.truncf %7 : vector<32x16xf32> to vector<32x16xbf16>
    %c0_6 = arith.constant 0 : index
    %c0_7 = arith.constant 0 : index
    %9 = vector.load %arg5[%c0_6, %c0_7] : memref<16x16xbf16, #tpu.memory_space<vmem>>, vector<16x16xbf16>
    %cst_8 = arith.constant dense<0.000000e+00> : vector<32x16xf32>
    %10 = tpu.matmul %8, %9, %cst_8 {dimension_numbers = #tpu.dot_dimension_numbers<[1], [0], [0], [1], [0, 0, 1, 1], [], []>} : vector<32x16xbf16>, vector<16x16xbf16>, vector<32x16xf32> -> vector<32x16xf32>
    %c0_9 = arith.constant 0 : index
    %c0_10 = arith.constant 0 : index
    %11 = vector.load %arg6[%c0_9, %c0_10] : memref<1x16xf32, #tpu.memory_space<vmem>>, vector<1x16xf32>
    %12 = vector.broadcast %11 : vector<1x16xf32> to vector<32x16xf32>
    %13 = arith.addf %10, %12 : vector<32x16xf32>
    %c0_11 = arith.constant 0 : index
    %c0_12 = arith.constant 0 : index
    %14 = vector.load %arg1[%c0_11, %c0_12] : memref<32x16xbf16, #tpu.memory_space<vmem>>, vector<32x16xbf16>
    %c0_13 = arith.constant 0 : index
    %c0_14 = arith.constant 0 : index
    %15 = vector.load %arg3[%c0_13, %c0_14] : memref<16x16xbf16, #tpu.memory_space<vmem>>, vector<16x16xbf16>
    %cst_15 = arith.constant dense<0.000000e+00> : vector<32x16xf32>
    %16 = tpu.matmul %14, %15, %cst_15 {dimension_numbers = #tpu.dot_dimension_numbers<[1], [0], [0], [1], [0, 0, 1, 1], [], []>} : vector<32x16xbf16>, vector<16x16xbf16>, vector<32x16xf32> -> vector<32x16xf32>
    %c0_16 = arith.constant 0 : index
    %c0_17 = arith.constant 0 : index
    %17 = vector.load %arg4[%c0_16, %c0_17] : memref<1x16xf32, #tpu.memory_space<vmem>>, vector<1x16xf32>
    %18 = vector.broadcast %17 : vector<1x16xf32> to vector<32x16xf32>
    %19 = arith.addf %16, %18 : vector<32x16xf32>
    %cst_18 = arith.constant 0.000000e+00 : f32
    %20 = vector.broadcast %cst_18 : f32 to vector<32x16xf32>
    %21 = arith.maximumf %19, %20 : vector<32x16xf32>
    %22 = arith.truncf %21 : vector<32x16xf32> to vector<32x16xbf16>
    %c0_19 = arith.constant 0 : index
    %c0_20 = arith.constant 0 : index
    %23 = vector.load %arg5[%c0_19, %c0_20] : memref<16x16xbf16, #tpu.memory_space<vmem>>, vector<16x16xbf16>
    %cst_21 = arith.constant dense<0.000000e+00> : vector<32x16xf32>
    %24 = tpu.matmul %22, %23, %cst_21 {dimension_numbers = #tpu.dot_dimension_numbers<[1], [0], [0], [1], [0, 0, 1, 1], [], []>} : vector<32x16xbf16>, vector<16x16xbf16>, vector<32x16xf32> -> vector<32x16xf32>
    %c0_22 = arith.constant 0 : index
    %c0_23 = arith.constant 0 : index
    %25 = vector.load %arg6[%c0_22, %c0_23] : memref<1x16xf32, #tpu.memory_space<vmem>>, vector<1x16xf32>
    %26 = vector.broadcast %25 : vector<1x16xf32> to vector<32x16xf32>
    %27 = arith.addf %24, %26 : vector<32x16xf32>
    %28 = arith.truncf %13 : vector<32x16xf32> to vector<32x16xbf16>
    %cst_24 = arith.constant 2.000000e+00 : f32
    %29 = vector.broadcast %cst_24 : f32 to vector<32x16xf32>
    %30 = arith.mulf %29, %27 : vector<32x16xf32>
    %31 = arith.truncf %30 : vector<32x16xf32> to vector<32x16xbf16>
    %cst_25 = arith.constant dense<0.000000e+00> : vector<32x32xf32>
    %32 = tpu.matmul %31, %28, %cst_25 {dimension_numbers = #tpu.dot_dimension_numbers<[1], [1], [0], [0], [0, 0, 1, 0], [], []>} : vector<32x16xbf16>, vector<32x16xbf16>, vector<32x32xf32> -> vector<32x32xf32>
    %33 = arith.extf %28 : vector<32x16xbf16> to vector<32x16xf32>
    %cst_26 = arith.constant 1.000000e+00 : f32
    %34 = vector.broadcast %cst_26 : f32 to vector<1x16xf32>
    %35 = arith.mulf %33, %33 : vector<32x16xf32>
    %cst_27 = arith.constant dense<0.000000e+00> : vector<1x32xf32>
    %36 = tpu.matmul %34, %35, %cst_27 {dimension_numbers = #tpu.dot_dimension_numbers<[1], [1], [0], [0], [0, 0, 1, 0], [], []>} : vector<1x16xf32>, vector<32x16xf32>, vector<1x32xf32> -> vector<1x32xf32>
    %37 = vector.broadcast %36 : vector<1x32xf32> to vector<32x32xf32>
    %38 = arith.subf %32, %37 : vector<32x32xf32>
    %39 = tpu.iota {dimensions = array<i32: 1>} : vector<32x32xi32>
    %40 = arith.sitofp %39 : vector<32x32xi32> to vector<32x32xf32>
    %c32_i32 = arith.constant 32 : i32
    %41 = arith.muli %arg0, %c32_i32 : i32
    %42 = tpu.iota {dimensions = array<i32: 0>} : vector<32x1xi32>
    %43 = vector.broadcast %41 : i32 to vector<32x1xi32>
    %44 = arith.addi %43, %42 : vector<32x1xi32>
    %c0_28 = arith.constant 0 : index
    %c0_29 = arith.constant 0 : index
    %45 = vector.load %arg7[%c0_28, %c0_29] : memref<32x4xi32, #tpu.memory_space<vmem>>, vector<32x1xi32>
    tpu.vector_store %arg7[%c0_28, %c0_29], %44 {strides = array<i32>} : memref<32x4xi32, #tpu.memory_space<vmem>>, vector<32x1xi32>,
    %46 = vector.broadcast %44 : vector<32x1xi32> to vector<32x32xi32>
    %47 = arith.cmpi eq, %39, %46 : vector<32x32xi32>
    %cst_30 = arith.constant 0xFF800000 : f32
    %48 = vector.broadcast %cst_30 : f32 to vector<32x32xf32>
    %49 = arith.select %47, %48, %38 : vector<32x32xi1>, vector<32x32xf32>
    %cst_31 = arith.constant dense<0xFF800000> : vector<32xf32>
    %50 = vector.multi_reduction <maximumf>, %49, %cst_31 [1] : vector<32x32xf32> to vector<32xf32>
    %51 = vector.shape_cast %50 : vector<32xf32> to vector<32x1xf32>
    %52 = vector.broadcast %51 : vector<32x1xf32> to vector<32x32xf32>
    %53 = arith.cmpf oeq, %49, %52 : vector<32x32xf32>
    %cst_32 = arith.constant 3.200000e+01 : f32
    %54 = vector.broadcast %cst_32 : f32 to vector<32x32xf32>
    %55 = arith.select %53, %40, %54 : vector<32x32xi1>, vector<32x32xf32>
    %cst_33 = arith.constant dense<0x7F800000> : vector<32xf32>
    %56 = vector.multi_reduction <minimumf>, %55, %cst_33 [1] : vector<32x32xf32> to vector<32xf32>
    %57 = vector.shape_cast %56 : vector<32xf32> to vector<32x1xf32>
    %58 = arith.fptosi %57 : vector<32x1xf32> to vector<32x1xi32>
    %c0_34 = arith.constant 0 : index
    %c1 = arith.constant 1 : index
    %59 = vector.load %arg7[%c0_34, %c1] : memref<32x4xi32, #tpu.memory_space<vmem>>, vector<32x1xi32>
    tpu.vector_store %arg7[%c0_34, %c1], %58 {strides = array<i32>} : memref<32x4xi32, #tpu.memory_space<vmem>>, vector<32x1xi32>,
    %60 = vector.broadcast %57 : vector<32x1xf32> to vector<32x32xf32>
    %61 = arith.cmpf oeq, %40, %60 : vector<32x32xf32>
    %cst_35 = arith.constant 0xFF800000 : f32
    %62 = vector.broadcast %cst_35 : f32 to vector<32x32xf32>
    %63 = arith.select %61, %62, %49 : vector<32x32xi1>, vector<32x32xf32>
    %cst_36 = arith.constant dense<0xFF800000> : vector<32xf32>
    %64 = vector.multi_reduction <maximumf>, %63, %cst_36 [1] : vector<32x32xf32> to vector<32xf32>
    %65 = vector.shape_cast %64 : vector<32xf32> to vector<32x1xf32>
    %66 = vector.broadcast %65 : vector<32x1xf32> to vector<32x32xf32>
    %67 = arith.cmpf oeq, %63, %66 : vector<32x32xf32>
    %cst_37 = arith.constant 3.200000e+01 : f32
    %68 = vector.broadcast %cst_37 : f32 to vector<32x32xf32>
    %69 = arith.select %67, %40, %68 : vector<32x32xi1>, vector<32x32xf32>
    %cst_38 = arith.constant dense<0x7F800000> : vector<32xf32>
    %70 = vector.multi_reduction <minimumf>, %69, %cst_38 [1] : vector<32x32xf32> to vector<32xf32>
    %71 = vector.shape_cast %70 : vector<32xf32> to vector<32x1xf32>
    %72 = arith.fptosi %71 : vector<32x1xf32> to vector<32x1xi32>
    %c0_39 = arith.constant 0 : index
    %c2 = arith.constant 2 : index
    %73 = vector.load %arg7[%c0_39, %c2] : memref<32x4xi32, #tpu.memory_space<vmem>>, vector<32x1xi32>
    tpu.vector_store %arg7[%c0_39, %c2], %72 {strides = array<i32>} : memref<32x4xi32, #tpu.memory_space<vmem>>, vector<32x1xi32>,
    %74 = vector.broadcast %71 : vector<32x1xf32> to vector<32x32xf32>
    %75 = arith.cmpf oeq, %40, %74 : vector<32x32xf32>
    %cst_40 = arith.constant 0xFF800000 : f32
    %76 = vector.broadcast %cst_40 : f32 to vector<32x32xf32>
    %77 = arith.select %75, %76, %63 : vector<32x32xi1>, vector<32x32xf32>
    %cst_41 = arith.constant dense<0xFF800000> : vector<32xf32>
    %78 = vector.multi_reduction <maximumf>, %77, %cst_41 [1] : vector<32x32xf32> to vector<32xf32>
    %79 = vector.shape_cast %78 : vector<32xf32> to vector<32x1xf32>
    %80 = vector.broadcast %79 : vector<32x1xf32> to vector<32x32xf32>
    %81 = arith.cmpf oeq, %77, %80 : vector<32x32xf32>
    %cst_42 = arith.constant 3.200000e+01 : f32
    %82 = vector.broadcast %cst_42 : f32 to vector<32x32xf32>
    %83 = arith.select %81, %40, %82 : vector<32x32xi1>, vector<32x32xf32>
    %cst_43 = arith.constant dense<0x7F800000> : vector<32xf32>
    %84 = vector.multi_reduction <minimumf>, %83, %cst_43 [1] : vector<32x32xf32> to vector<32xf32>
    %85 = vector.shape_cast %84 : vector<32xf32> to vector<32x1xf32>
    %86 = arith.fptosi %85 : vector<32x1xf32> to vector<32x1xi32>
    %c0_44 = arith.constant 0 : index
    %c3 = arith.constant 3 : index
    %87 = vector.load %arg7[%c0_44, %c3] : memref<32x4xi32, #tpu.memory_space<vmem>>, vector<32x1xi32>
    tpu.vector_store %arg7[%c0_44, %c3], %86 {strides = array<i32>} : memref<32x4xi32, #tpu.memory_space<vmem>>, vector<32x1xi32>,
    return
  }
  func.func @transform_0(%arg0: i32) -> (i32, i32) {
    %c0_i32 = arith.constant 0 : i32
    %c0_i32_0 = arith.constant 0 : i32
    return %arg0, %c0_i32 : i32, i32
  }
  func.func @transform_1(%arg0: i32) -> (i32, i32) {
    %c0_i32 = arith.constant 0 : i32
    %c0_i32_0 = arith.constant 0 : i32
    %c0_i32_1 = arith.constant 0 : i32
    return %c0_i32, %c0_i32_0 : i32, i32
  }
  func.func @transform_2(%arg0: i32) -> (i32, i32) {
    %c0_i32 = arith.constant 0 : i32
    %c0_i32_0 = arith.constant 0 : i32
    %c0_i32_1 = arith.constant 0 : i32
    return %c0_i32, %c0_i32_0 : i32, i32
  }
  func.func @transform_3(%arg0: i32) -> (i32, i32) {
    %c0_i32 = arith.constant 0 : i32
    %c0_i32_0 = arith.constant 0 : i32
    %c0_i32_1 = arith.constant 0 : i32
    return %c0_i32, %c0_i32_0 : i32, i32
  }
  func.func @transform_4(%arg0: i32) -> (i32, i32) {
    %c0_i32 = arith.constant 0 : i32
    %c0_i32_0 = arith.constant 0 : i32
    %c0_i32_1 = arith.constant 0 : i32
    return %c0_i32, %c0_i32_0 : i32, i32
  }
  func.func @transform_5(%arg0: i32) -> (i32, i32) {
    %c0_i32 = arith.constant 0 : i32
    %c0_i32_0 = arith.constant 0 : i32
    %c0_i32_1 = arith.constant 0 : i32
    return %c0_i32, %c0_i32_0 : i32, i32
  }
  func.func @transform_6(%arg0: i32) -> (i32, i32) {
    %c0_i32 = arith.constant 0 : i32
    %c0_i32_0 = arith.constant 0 : i32
    return %arg0, %c0_i32 : i32, i32
  }
}

module attributes {stable_mosaic.version = 11 : i64} {
  func.func @_dual_gcn_kernel(%arg0: memref<32x4xi32, #tpu.memory_space<vmem>>, %arg1: memref<32x4xf32, #tpu.memory_space<vmem>>, %arg2: memref<32x16xbf16, #tpu.memory_space<vmem>>, %arg3: memref<32x16xf32, #tpu.memory_space<vmem>>, %arg4: memref<16x16xbf16, #tpu.memory_space<vmem>>, %arg5: memref<16x16xbf16, #tpu.memory_space<vmem>>, %arg6: memref<1x32xf32, #tpu.memory_space<vmem>>, %arg7: memref<32x128xbf16, #tpu.memory_space<vmem>>, %arg8: memref<1x128xf32, #tpu.memory_space<vmem>>, %arg9: memref<32x128xf32, #tpu.memory_space<vmem>>, %arg10: memref<32x32xf32, #tpu.memory_space<vmem>>) attributes {dimension_semantics = [], scalar_prefetch = 0 : i64, scratch_operands = 1 : i64, tpu.core_type = #tpu.core_type<tc>} {
    %0 = tpu.iota {dimensions = array<i32: 1>} : vector<32x32xi32>
    %cst = arith.constant 0.000000e+00 : f32
    %1 = vector.broadcast %cst : f32 to vector<32x32xf32>
    %c0 = arith.constant 0 : index
    %c0_0 = arith.constant 0 : index
    %2 = vector.load %arg0[%c0, %c0_0] : memref<32x4xi32, #tpu.memory_space<vmem>>, vector<32x1xi32>
    %3 = vector.broadcast %2 : vector<32x1xi32> to vector<32x32xi32>
    %4 = arith.cmpi eq, %0, %3 : vector<32x32xi32>
    %c0_1 = arith.constant 0 : index
    %c0_2 = arith.constant 0 : index
    %5 = vector.load %arg1[%c0_1, %c0_2] : memref<32x4xf32, #tpu.memory_space<vmem>>, vector<32x1xf32>
    %cst_3 = arith.constant 0.000000e+00 : f32
    %6 = vector.shape_cast %5 : vector<32x1xf32> to vector<32x1xf32>
    %7 = vector.broadcast %6 : vector<32x1xf32> to vector<32x32xf32>
    %8 = vector.broadcast %cst_3 : f32 to vector<32x32xf32>
    %9 = arith.select %4, %7, %8 : vector<32x32xi1>, vector<32x32xf32>
    %10 = arith.addf %1, %9 : vector<32x32xf32>
    %c0_4 = arith.constant 0 : index
    %c1 = arith.constant 1 : index
    %11 = vector.load %arg0[%c0_4, %c1] : memref<32x4xi32, #tpu.memory_space<vmem>>, vector<32x1xi32>
    %12 = vector.broadcast %11 : vector<32x1xi32> to vector<32x32xi32>
    %13 = arith.cmpi eq, %0, %12 : vector<32x32xi32>
    %c0_5 = arith.constant 0 : index
    %c1_6 = arith.constant 1 : index
    %14 = vector.load %arg1[%c0_5, %c1_6] : memref<32x4xf32, #tpu.memory_space<vmem>>, vector<32x1xf32>
    %cst_7 = arith.constant 0.000000e+00 : f32
    %15 = vector.shape_cast %14 : vector<32x1xf32> to vector<32x1xf32>
    %16 = vector.broadcast %15 : vector<32x1xf32> to vector<32x32xf32>
    %17 = vector.broadcast %cst_7 : f32 to vector<32x32xf32>
    %18 = arith.select %13, %16, %17 : vector<32x32xi1>, vector<32x32xf32>
    %19 = arith.addf %10, %18 : vector<32x32xf32>
    %c0_8 = arith.constant 0 : index
    %c2 = arith.constant 2 : index
    %20 = vector.load %arg0[%c0_8, %c2] : memref<32x4xi32, #tpu.memory_space<vmem>>, vector<32x1xi32>
    %21 = vector.broadcast %20 : vector<32x1xi32> to vector<32x32xi32>
    %22 = arith.cmpi eq, %0, %21 : vector<32x32xi32>
    %c0_9 = arith.constant 0 : index
    %c2_10 = arith.constant 2 : index
    %23 = vector.load %arg1[%c0_9, %c2_10] : memref<32x4xf32, #tpu.memory_space<vmem>>, vector<32x1xf32>
    %cst_11 = arith.constant 0.000000e+00 : f32
    %24 = vector.shape_cast %23 : vector<32x1xf32> to vector<32x1xf32>
    %25 = vector.broadcast %24 : vector<32x1xf32> to vector<32x32xf32>
    %26 = vector.broadcast %cst_11 : f32 to vector<32x32xf32>
    %27 = arith.select %22, %25, %26 : vector<32x32xi1>, vector<32x32xf32>
    %28 = arith.addf %19, %27 : vector<32x32xf32>
    %c0_12 = arith.constant 0 : index
    %c3 = arith.constant 3 : index
    %29 = vector.load %arg0[%c0_12, %c3] : memref<32x4xi32, #tpu.memory_space<vmem>>, vector<32x1xi32>
    %30 = vector.broadcast %29 : vector<32x1xi32> to vector<32x32xi32>
    %31 = arith.cmpi eq, %0, %30 : vector<32x32xi32>
    %c0_13 = arith.constant 0 : index
    %c3_14 = arith.constant 3 : index
    %32 = vector.load %arg1[%c0_13, %c3_14] : memref<32x4xf32, #tpu.memory_space<vmem>>, vector<32x1xf32>
    %cst_15 = arith.constant 0.000000e+00 : f32
    %33 = vector.shape_cast %32 : vector<32x1xf32> to vector<32x1xf32>
    %34 = vector.broadcast %33 : vector<32x1xf32> to vector<32x32xf32>
    %35 = vector.broadcast %cst_15 : f32 to vector<32x32xf32>
    %36 = arith.select %31, %34, %35 : vector<32x32xi1>, vector<32x32xf32>
    %37 = arith.addf %28, %36 : vector<32x32xf32>
    %38 = arith.truncf %37 : vector<32x32xf32> to vector<32x32xbf16>
    %c0_16 = arith.constant 0 : index
    %c0_17 = arith.constant 0 : index
    %39 = vector.load %arg2[%c0_16, %c0_17] : memref<32x16xbf16, #tpu.memory_space<vmem>>, vector<32x16xbf16>
    %40 = arith.extf %39 : vector<32x16xbf16> to vector<32x16xf32>
    %c0_18 = arith.constant 0 : index
    %c0_19 = arith.constant 0 : index
    %41 = vector.load %arg3[%c0_18, %c0_19] : memref<32x16xf32, #tpu.memory_space<vmem>>, vector<32x16xf32>
    %cst_20 = arith.constant 1.000000e+00 : f32
    %42 = vector.broadcast %cst_20 : f32 to vector<32x16xf32>
    %43 = arith.subf %42, %41 : vector<32x16xf32>
    %44 = arith.mulf %40, %43 : vector<32x16xf32>
    %45 = arith.truncf %44 : vector<32x16xf32> to vector<32x16xbf16>
    %c0_21 = arith.constant 0 : index
    %c0_22 = arith.constant 0 : index
    %46 = vector.load %arg4[%c0_21, %c0_22] : memref<16x16xbf16, #tpu.memory_space<vmem>>, vector<16x16xbf16>
    %cst_23 = arith.constant dense<0.000000e+00> : vector<32x16xf32>
    %47 = tpu.matmul %39, %46, %cst_23 {dimension_numbers = #tpu.dot_dimension_numbers<[1], [0], [0], [1], [0, 0, 1, 1], [], []>} : vector<32x16xbf16>, vector<16x16xbf16>, vector<32x16xf32> -> vector<32x16xf32>
    %c0_24 = arith.constant 0 : index
    %c0_25 = arith.constant 0 : index
    %48 = vector.load %arg10[%c0_24, %c0_25] : memref<32x32xf32, #tpu.memory_space<vmem>>, vector<32x16xf32>
    tpu.vector_store %arg10[%c0_24, %c0_25], %47 {strides = array<i32>} : memref<32x32xf32, #tpu.memory_space<vmem>>, vector<32x16xf32>,
    %c0_26 = arith.constant 0 : index
    %c0_27 = arith.constant 0 : index
    %49 = vector.load %arg5[%c0_26, %c0_27] : memref<16x16xbf16, #tpu.memory_space<vmem>>, vector<16x16xbf16>
    %cst_28 = arith.constant dense<0.000000e+00> : vector<32x16xf32>
    %50 = tpu.matmul %45, %49, %cst_28 {dimension_numbers = #tpu.dot_dimension_numbers<[1], [0], [0], [1], [0, 0, 1, 1], [], []>} : vector<32x16xbf16>, vector<16x16xbf16>, vector<32x16xf32> -> vector<32x16xf32>
    %c0_29 = arith.constant 0 : index
    %c16 = arith.constant 16 : index
    %51 = vector.load %arg10[%c0_29, %c16] : memref<32x32xf32, #tpu.memory_space<vmem>>, vector<32x16xf32>
    tpu.vector_store %arg10[%c0_29, %c16], %50 {strides = array<i32>} : memref<32x32xf32, #tpu.memory_space<vmem>>, vector<32x16xf32>,
    %c0_30 = arith.constant 0 : index
    %c0_31 = arith.constant 0 : index
    %52 = vector.load %arg10[%c0_30, %c0_31] : memref<32x32xf32, #tpu.memory_space<vmem>>, vector<32x32xf32>
    %53 = arith.truncf %52 : vector<32x32xf32> to vector<32x32xbf16>
    %cst_32 = arith.constant dense<0.000000e+00> : vector<32x32xf32>
    %54 = tpu.matmul %38, %53, %cst_32 {dimension_numbers = #tpu.dot_dimension_numbers<[1], [0], [0], [1], [0, 0, 1, 1], [], []>} : vector<32x32xbf16>, vector<32x32xbf16>, vector<32x32xf32> -> vector<32x32xf32>
    %c0_33 = arith.constant 0 : index
    %c0_34 = arith.constant 0 : index
    %55 = vector.load %arg6[%c0_33, %c0_34] : memref<1x32xf32, #tpu.memory_space<vmem>>, vector<1x32xf32>
    %56 = vector.broadcast %55 : vector<1x32xf32> to vector<32x32xf32>
    %57 = arith.addf %54, %56 : vector<32x32xf32>
    %cst_35 = arith.constant 0.000000e+00 : f32
    %58 = vector.broadcast %cst_35 : f32 to vector<32x32xf32>
    %59 = arith.maximumf %57, %58 : vector<32x32xf32>
    %60 = arith.truncf %59 : vector<32x32xf32> to vector<32x32xbf16>
    %c0_36 = arith.constant 0 : index
    %c0_37 = arith.constant 0 : index
    %61 = vector.load %arg7[%c0_36, %c0_37] : memref<32x128xbf16, #tpu.memory_space<vmem>>, vector<32x128xbf16>
    %cst_38 = arith.constant dense<0.000000e+00> : vector<32x128xf32>
    %62 = tpu.matmul %60, %61, %cst_38 {dimension_numbers = #tpu.dot_dimension_numbers<[1], [0], [0], [1], [0, 0, 1, 1], [], []>} : vector<32x32xbf16>, vector<32x128xbf16>, vector<32x128xf32> -> vector<32x128xf32>
    %63 = arith.truncf %62 : vector<32x128xf32> to vector<32x128xbf16>
    %cst_39 = arith.constant dense<0.000000e+00> : vector<32x128xf32>
    %64 = tpu.matmul %38, %63, %cst_39 {dimension_numbers = #tpu.dot_dimension_numbers<[1], [0], [0], [1], [0, 0, 1, 1], [], []>} : vector<32x32xbf16>, vector<32x128xbf16>, vector<32x128xf32> -> vector<32x128xf32>
    %c0_40 = arith.constant 0 : index
    %c0_41 = arith.constant 0 : index
    %65 = vector.load %arg8[%c0_40, %c0_41] : memref<1x128xf32, #tpu.memory_space<vmem>>, vector<1x128xf32>
    %66 = vector.broadcast %65 : vector<1x128xf32> to vector<32x128xf32>
    %67 = arith.addf %64, %66 : vector<32x128xf32>
    %c0_42 = arith.constant 0 : index
    %c0_43 = arith.constant 0 : index
    %68 = vector.load %arg9[%c0_42, %c0_43] : memref<32x128xf32, #tpu.memory_space<vmem>>, vector<32x128xf32>
    tpu.vector_store %arg9[%c0_42, %c0_43], %67 {strides = array<i32>} : memref<32x128xf32, #tpu.memory_space<vmem>>, vector<32x128xf32>,
    return
  }
}

</mosaic_0001>

<bundles_post_ra>
// kernel: mul.2
= control target key start
LH: loop header
LB: loop body
LE: loop exit
PB: predicated region body
PF: predicated region fallthrough
CT: control target
= control target key end

     0   :  { %s34_s0 = inlined_call_operand.vmem [shape: f32[128], index: 0, kind: input, shape index: {}]   ;;  %s35_s1 = inlined_call_operand.vmem [shape: f32[128], index: 1, kind: input, shape index: {}]   ;;  %s36_s2 = inlined_call_operand.vmem [shape: f32[128], index: 2, kind: output, shape index: {}]  }
   0x1   :  { %v3_v0 = vld [vmem:[%s34_s0] sm:$0x1] }
   0x2   :  { %v4_v1 = vld [vmem:[%s35_s1] sm:$0x1] }
   0x3   :  { %v7_v2 = vmul.f32 %v4_v1, %v3_v0 }
   0x5   :  { %9 = vst [vmem:[%s36_s2] sm:$0x1] %v7_v2 }

// kernel: mlp_knn_gnn_featrec_forward.3
= control target key start
LH: loop header
LB: loop body
LE: loop exit
PB: predicated region body
PF: predicated region fallthrough
CT: control target
= control target key end

     0   :  { %vm249_vm0 = vcmask 130048   ;;  %v520_v8 = vmov 1   ;;  %v521_v9 = vmov 0   ;;  %v522_v22 = vmov 3   ;;  %s524_s18 = smov 16   ;;  %s724_s4 = inlined_call_operand.vmem [shape: bf16[16,16], index: 4, kind: input, shape index: {}]   ;;  %s725_s2 = inlined_call_operand.vmem [shape: bf16[32,16], index: 2, kind: input, shape index: {}]   ;;  %s726_s5 = inlined_call_operand.vmem [shape: bf16[16,16], index: 5, kind: input, shape index: {}]   ;;  %s727_s0 = inlined_call_operand.vmem [shape: s32[32,4], index: 0, kind: input, shape index: {}]   ;;  %s728_s3 = inlined_call_operand.vmem [shape: f32[32,16], index: 3, kind: input, shape index: {}]   ;;  %s729_s1 = inlined_call_operand.vmem [shape: f32[32,4], index: 1, kind: input, shape index: {}]   ;;  %s730_s6 = inlined_call_operand.vmem [shape: f32[1,32], index: 6, kind: input, shape index: {}]   ;;  %s731_s7 = inlined_call_operand.vmem [shape: bf16[32,128], index: 7, kind: input, shape index: {}]   ;;  %s732_s8 = inlined_call_operand.vmem [shape: f32[1,128], index: 8, kind: input, shape index: {}]   ;;  %s733_s9 = inlined_call_operand.vmem [shape: f32[32,128], index: 9, kind: output, shape index: {}]  }
   0x1   :  { %v485_v0 = vld [vmem:[%s724_s4] sm:$0xff]  ;;  %v484_v2 = vld [vmem:[%s725_s2 + $0x8] sm:$0xff]  ;;  %497 = vset.pattern.permute.xlu1 %v520_v8  ;;  %496 = vset.pattern.permute.xlu0 %v520_v8  ;;  %v219_v19 = vld [vmem:[%s728_s3 + $0x10] sm:$0xff]  ;;  %v523_v23 = vmov 2   ;;  %v33_v39 = vlaneseq  ;;  %vm328_vm4 = vcmask 261248   ;;  %vm343_vm10 = vcmask 261120  }
   0x2   :  { %v486_v1 = vld [vmem:[%s726_s5] sm:$0xff]  ;;  %489 = vmatpush.bf16.msra.mxu1 %v485_v0  ;;  %263 = vmatpush.bf16.msra.mxu0 %v485_v0  ;;  %v36_v3 = vld [vmem:[%s727_s0 + $0x8] sm:$0xff]  ;;  %v220_v20 = vld [vmem:[%s728_s3 + $0x18] sm:$0xff]  ;;  %v223_v26 = vsub.f32 1.0, %v219_v19 }
   0x3   :  { %v35_v4 = vld [vmem:[%s727_s0] sm:$0xff]  ;;  %v218_v7 = vld [vmem:[%s728_s3 + $0x8] sm:$0xff]  ;;  %91 = vperm.xlu1 %497, %v36_v3   ;;  %495 = vset.pattern.permute.xlu2 %v521_v9  ;;  %v224_v27 = vsub.f32 1.0, %v220_v20  ;;  %v631_v31 = vld [vmem:[%s727_s0 + $0x10] sm:$0xff]  ;;  %v659_v41 = vand.u32 127, %v33_v39 }
   0x4   :  { %v209_v5 = vld [vmem:[%s725_s2] sm:$0xff]   ;;  %88 = vperm.xlu0 %496, %v35_v4   ;;  %v222_v13 = vsub.f32 1.0, %v218_v7  ;;  %40 = vperm.xlu2 %495, %v35_v4   ;;  %v56_v16 = vld [vmem:[%s729_s1 + $0x8] sm:$0xff]  ;;  %v57_v32 = vld [vmem:[%s729_s1 + $0x10] sm:$0xff] }
   0x5   :  { %462 = vmatmul.msk.bf16.vlgmr.msra.gmra.mxu1 %vm249_vm0, %v484_v2  ;;  %v217_v6 = vld [vmem:[%s728_s3] sm:$0xff]  ;;  %v213_v10 = vunpack.c.l.bf16 %v209_v5  ;;  %v214_v11 = vunpack.c.h.bf16 %v209_v5  ;;  %v211_v18 = vld [vmem:[%s725_s2 + $0x8] sm:$0xff]   ;;  %v38_v34 = vld [vmem:[%s727_s0 + $0x18] sm:$0xff] }
   0x6   :  { %300 = vmatpush.bf16.msrb.mxu1 %v486_v1  ;;  %v221_v12 = vsub.f32 1.0, %v217_v6  ;;  %v618_v21 = vld [vmem:[%s729_s1] sm:$0xff]  ;;  %v215_v24 = vunpack.c.l.bf16 %v211_v18  ;;  %v216_v25 = vunpack.c.h.bf16 %v211_v18  ;;  %v58_v38 = vld [vmem:[%s729_s1 + $0x18] sm:$0xff] }
   0x7   :  { %v226_v15 = vmul.f32 %v222_v13, %v214_v11  ;;  %v483_v33 = vld [vmem:[%s725_s2] sm:$0xff] }
   0x8   :  { %v225_v14 = vmul.f32 %v221_v12, %v213_v10  ;;  %v227_v28 = vmul.f32 %v223_v26, %v215_v24  ;;  %v228_v29 = vmul.f32 %v224_v27, %v216_v25  ;;  %461 = vmatmul.msk.bf16.vlgmr.msra.gmra.mxu0 %vm249_vm0, %v483_v33 }
   0xa   :  { %v229_v17 = vpack.c.bf16 %v226_v15, %v225_v14  ;;  %v230_v30 = vpack.c.bf16 %v228_v29, %v227_v28 }
   0xb   :  { %498 = vset.pattern.permute.xlu1 %v521_v9 }
   0xc   :  { %108 = vperm.xlu0 %496, %v56_v16   ;;  %66 = vperm.xlu1 %498, %v56_v16  }
   0xd   :  { %43 = vperm.xlu2 %495, %v36_v3  }
  0x14   :  { %504 = vset.pattern.permute.xlu0 %v522_v22  ;;  %500 = vset.pattern.permute.xlu1 %v523_v23 }
  0x15   :  { %467 = vmatmul.msk.bf16.vlgmr.msrb.gmra.mxu1 %vm249_vm0, %v229_v17  ;;  %188 = vperm.xlu0 %504, %v56_v16  }
  0x16   :  { %128 = vperm.xlu1 %500, %v35_v4   ;;  %61 = vperm.xlu2 %495, %v618_v21  }
  0x1d   :  { %509 = vset.pattern.permute.xlu0 %v521_v9 }
  0x1e   :  { %148 = vperm.xlu1 %500, %v56_v16   ;;  %499 = vset.pattern.permute.xlu2 %v520_v8 }
  0x1f   :  { %104 = vperm.xlu2 %499, %v618_v21   ;;  %71 = vperm.xlu0 %509, %v57_v32  }
  0x25   :  { %468 = vmatmul.msk.bf16.gmra.mxu1 %vm249_vm0, %v230_v30 }
  0x26   :  { %503 = vset.pattern.permute.xlu1 %v522_v22 }
  0x27   :  { %171 = vperm.xlu1 %503, %v36_v3   ;;  %501 = vset.pattern.permute.xlu2 %v523_v23 }
  0x28   :  { %131 = vperm.xlu2 %501, %v36_v3   ;;  %510 = vset.pattern.permute.xlu0 %v523_v23 }
  0x2f   :  { %505 = vset.pattern.permute.xlu1 %v521_v9 }
  0x30   :  { %502 = vset.pattern.permute.xlu2 %v522_v22  ;;  %46 = vperm.xlu1 %505, %v631_v31  }
  0x31   :  { %168 = vperm.xlu2 %502, %v35_v4  }
  0x38   :  { %507 = vset.pattern.permute.xlu1 %v520_v8 }
  0x39   :  { %184 = vperm.xlu2 %502, %v618_v21   ;;  %94 = vperm.xlu1 %507, %v631_v31  }
  0x41   :  { %506 = vset.pattern.permute.xlu2 %v521_v9  ;;  %511 = vset.pattern.permute.xlu1 %v521_v9 }
  0x42   :  { %49 = vperm.xlu2 %506, %v38_v34  }
  0x4a   :  { %508 = vset.pattern.permute.xlu2 %v520_v8 }
  0x4b   :  { %97 = vperm.xlu2 %508, %v38_v34  }
  0x53   :  { %112 = vperm.xlu2 %508, %v57_v32  }
  0x5b   :  { %513 = vset.pattern.permute.xlu2 %v523_v23 }
  0x5c   :  { %134 = vperm.xlu2 %513, %v631_v31  }
  0x5e   :  { %v654_v37 = vpop.permute.xlu2 %40 }
  0x5f   :  { %vm51_vm5 = vcmp.eq.s32.totalorder %v659_v41, %v654_v37 }
  0x64   :  { %156 = vperm.xlu2 %513, %v58_v38  }
  0x67   :  { %v44_v43 = vpop.permute.xlu2 %43 }
  0x68   :  { %vm52_vm1 = vcmp.eq.s32.totalorder %v659_v41, %v44_v43 }
  0x6c   :  { %516 = vset.pattern.permute.xlu2 %v522_v22 }
  0x6d   :  { %177 = vperm.xlu2 %516, %v38_v34  }
  0x70   :  { %v62_v47 = vpop.permute.xlu2 %61 }
  0x71   :  { %v79_v15 = vsel %vm51_vm5, %v62_v47, 0.0 }
  0x75   :  { %v92_v40 = vpop.permute.xlu1 %91 }
  0x76   :  { %v89_v48 = vpop.permute.xlu0 %88  ;;  %vm100_vm2 = vcmp.eq.s32.totalorder %v659_v41, %v92_v40 }
  0x77   :  { %vm99_vm6 = vcmp.eq.s32.totalorder %v659_v41, %v89_v48 }
  0x79   :  { %v105_v51 = vpop.permute.xlu2 %104 }
  0x7a   :  { %v119_v16 = vsel %vm99_vm6, %v105_v51, 0.0 }
  0x7b   :  { %v123_v17 = vadd.f32 %v119_v16, %v79_v15 }
  0x7e   :  { %v67_v44 = vpop.permute.xlu1 %66  ;;  %v109_v52 = vpop.permute.xlu0 %108 }
  0x7f   :  { %v80_v45 = vsel %vm52_vm1, %v67_v44, 0.0  ;;  %v120_v53 = vsel %vm100_vm2, %v109_v52, 0.0 }
  0x80   :  { %v124_v54 = vadd.f32 %v120_v53, %v80_v45 }
  0x82   :  { %v270_v35 = vpop.f32.mrf.mxu1  ;;  %v132_v56 = vpop.permute.xlu2 %131 }
  0x83   :  { %277 = vst.msk [vmem:[#allocation2 + $0x10] sm:$0xff] %vm249_vm0, %v270_v35  ;;  %vm140_vm3 = vcmp.eq.s32.totalorder %v659_v41, %v132_v56  ;;  %v487_v56 = vld [vmem:[%s731_s7] sm:$0xff] }
  0x85   :  { %v265_v60 = vpop.f32.mrf.mxu0 }
  0x86   :  { %275 = vst.msk [vmem:[#allocation2] sm:$0xff] %vm249_vm0, %v265_v60 }
  0x87   :  { %v189_v3 = vpop.permute.xlu0 %188 }
  0x88   :  { %v663_v50 = vpop.permute.xlu1 %128 }
  0x89   :  { %vm139_vm8 = vcmp.eq.s32.totalorder %v659_v41, %v663_v50 }
  0x8a   :  { %v272_v36 = vpop.f32.mrf.mxu1 }
  0x8b   :  { %278 = vst.msk [vmem:[#allocation2 + $0x18] sm:$0xff] %vm249_vm0, %v272_v36  ;;  %v169_v63 = vpop.permute.xlu2 %168 }
  0x8c   :  { %vm179_vm9 = vcmp.eq.s32.totalorder %v659_v41, %v169_v63 }
  0x8d   :  { %v267_v61 = vpop.f32.mrf.mxu0 }
  0x8e   :  { %276 = vst.msk [vmem:[#allocation2 + $0x8] sm:$0xff] %vm249_vm0, %v267_v61 }
  0x90   :  { %v149_v57 = vpop.permute.xlu1 %148 }
  0x91   :  { %v160_v58 = vsel %vm140_vm3, %v149_v57, 0.0  ;;  %v72_v6 = vpop.permute.xlu0 %71  ;;  %v518_v57 = vld [vmem:[%s730_s6] ss:$0 sm:$0xff] }
  0x92   :  { %v302_v42 = vpop.f32.mrf.mxu1  ;;  %v164_v59 = vadd.f32 %v160_v58, %v124_v54 }
  0x93   :  { %316 = vrot.lane.b32.xlu1 %v302_v42, %s524_s18  ;;  %v185_v1 = vpop.permute.xlu2 %184 }
  0x94   :  { %v199_v27 = vsel %vm179_vm9, %v185_v1, 0.0 }
  0x99   :  { %v172_v62 = vpop.permute.xlu1 %171 }
  0x9a   :  { %v304_v46 = vpop.f32.mrf.mxu1  ;;  %vm180_vm7 = vcmp.eq.s32.totalorder %v659_v41, %v172_v62 }
  0x9b   :  { %318 = vrot.lane.b32.xlu1 %v304_v46, %s524_s18 }
  0x9c   :  { %v50_v4 = vpop.permute.xlu2 %49 }
  0x9d   :  { %vm54_vm0 = vcmp.eq.s32.totalorder %v659_v41, %v50_v4 }
  0xa2   :  { %v307_v49 = vpop.f32.mrf.mxu1  ;;  %v47_v0 = vpop.permute.xlu1 %46 }
  0xa3   :  { %76 = vperm.xlu1 %511, %v58_v38   ;;  %320 = vrot.lane.b32.xlu0 %v307_v49, %s524_s18  ;;  %vm53_vm11 = vcmp.eq.s32.totalorder %v659_v41, %v47_v0 }
  0xa4   :  { %v81_v36 = vsel %vm53_vm11, %v72_v6, 0.0 }
  0xaa   :  { %v309_v55 = vpop.f32.mrf.mxu1 }
  0xab   :  { %512 = vset.pattern.permute.xlu1 %v520_v8  ;;  %322 = vrot.lane.b32.xlu0 %v309_v55, %s524_s18  ;;  %v95_v2 = vpop.permute.xlu1 %94  ;;  %v98_v8 = vpop.permute.xlu2 %97  ;;  %v488_v55 = vld [vmem:[%s731_s7 + $0x8] sm:$0xff] }
  0xac   :  { %116 = vperm.xlu1 %512, %v58_v38   ;;  %vm101_vm12 = vcmp.eq.s32.totalorder %v659_v41, %v95_v2  ;;  %vm102_vm13 = vcmp.eq.s32.totalorder %v659_v41, %v98_v8  ;;  %403 = vmatpush.bf16.msra.mxu3 %v488_v55 }
  0xb0   :  { %404 = vmatpush.bf16.msra.mxu3 %v487_v56 }
  0xb3   :  { %144 = vperm.xlu0 %510, %v618_v21   ;;  %v113_v11 = vpop.permute.xlu2 %112  ;;  %v200_v21 = vsel %vm180_vm7, %v189_v3, 0.0 }
  0xb4   :  { %514 = vset.pattern.permute.xlu1 %v523_v23  ;;  %v204_v28 = vadd.f32 %v200_v21, %v164_v59  ;;  %v121_v37 = vsel %vm101_vm12, %v113_v11, 0.0 }
  0xb5   :  { %152 = vperm.xlu1 %514, %v57_v32   ;;  %v125_v44 = vadd.f32 %v121_v37, %v81_v36 }
  0xbb   :  { %137 = vperm.xlu0 %510, %v38_v34   ;;  %v135_v14 = vpop.permute.xlu2 %134 }
  0xbc   :  { %vm141_vm14 = vcmp.eq.s32.totalorder %v659_v41, %v135_v14 }
  0xbd   :  { %515 = vset.pattern.permute.xlu1 %v522_v22 }
  0xbe   :  { %174 = vperm.xlu1 %515, %v631_v31  }
  0xc3   :  { %517 = vset.pattern.permute.xlu0 %v522_v22 }
  0xc4   :  { %192 = vperm.xlu0 %517, %v57_v32   ;;  %v157_v32 = vpop.permute.xlu2 %156 }
  0xc6   :  { %196 = vperm.xlu1 %515, %v58_v38  }
  0xcc   :  { %v178_v39 = vpop.permute.xlu2 %177 }
  0xcd   :  { %vm182_vm2 = vcmp.eq.s32.totalorder %v659_v41, %v178_v39 }
 0x105   :  { %v317_v5 = vpop.permute.xlu1 %316 }
 0x106   :  { %329 = vst.msk [vmem:[#allocation2] sm:$0xff] %vm328_vm4, %v317_v5 }
 0x10d   :  { %v319_v7 = vpop.permute.xlu1 %318  ;;  %v333_v30 = vld [vmem:[#allocation2] sm:$0xff] }
 0x10e   :  { %330 = vst.msk [vmem:[#allocation2 + $0x8] sm:$0xff] %vm328_vm4, %v319_v7 }
 0x115   :  { %v77_v9 = vpop.permute.xlu1 %76  ;;  %v321_v10 = vpop.permute.xlu0 %320  ;;  %v334_v26 = vld [vmem:[#allocation2 + $0x8] sm:$0xff] }
 0x116   :  { %331 = vst.msk [vmem:[#allocation2 + $0x10] sm:$0xff] %vm328_vm4, %v321_v10  ;;  %v337_v31 = vpack.c.bf16 %v334_v26, %v333_v30  ;;  %v82_v40 = vsel %vm54_vm0, %v77_v9, 0.0 }
 0x11d   :  { %v323_v12 = vpop.permute.xlu0 %322  ;;  %v335_v19 = vld [vmem:[#allocation2 + $0x10] sm:$0xff] }
 0x11e   :  { %332 = vst.msk [vmem:[#allocation2 + $0x18] sm:$0xff] %vm328_vm4, %v323_v12  ;;  %v117_v13 = vpop.permute.xlu1 %116 }
 0x11f   :  { %v122_v38 = vsel %vm102_vm13, %v117_v13, 0.0  ;;  %v519_v13 = vld [vmem:[%s732_s8] ss:$0 sm:$0xff] }
 0x120   :  { %v126_v45 = vadd.f32 %v122_v38, %v82_v40 }
 0x125   :  { %v145_v18 = vpop.permute.xlu0 %144  ;;  %v336_v20 = vld [vmem:[#allocation2 + $0x18] sm:$0xff] }
 0x126   :  { %v159_v22 = vsel %vm139_vm8, %v145_v18, 0.0  ;;  %v338_v23 = vpack.c.bf16 %v336_v20, %v335_v19 }
 0x127   :  { %v163_v24 = vadd.f32 %v159_v22, %v123_v17  ;;  %v153_v25 = vpop.permute.xlu1 %152 }
 0x128   :  { %356 = vmatpush.bf16.msra.mxu2 %v338_v23  ;;  %v161_v42 = vsel %vm141_vm14, %v153_v25, 0.0 }
 0x129   :  { %v203_v29 = vadd.f32 %v199_v27, %v163_v24  ;;  %v165_v48 = vadd.f32 %v161_v42, %v125_v44 }
 0x12b   :  { %v682_v33 = vpack.c.bf16 %v204_v28, %v203_v29 }
 0x12c   :  { %357 = vmatpush.bf16.msra.mxu2 %v337_v31 }
 0x12d   :  { %v138_v34 = vpop.permute.xlu0 %137 }
 0x12e   :  { %vm142_vm15 = vcmp.eq.s32.totalorder %v659_v41, %v138_v34 }
 0x12f   :  { %469 = vmatmul.msk.bf16.vlgmr.msra.gmra.mxu2 %vm343_vm10, %v682_v33  ;;  %v162_v43 = vsel %vm142_vm15, %v157_v32, 0.0 }
 0x130   :  { %v175_v35 = vpop.permute.xlu1 %174  ;;  %v166_v49 = vadd.f32 %v162_v43, %v126_v45 }
 0x131   :  { %vm181_vm1 = vcmp.eq.s32.totalorder %v659_v41, %v175_v35 }
 0x136   :  { %v193_v46 = vpop.permute.xlu0 %192 }
 0x137   :  { %v201_v47 = vsel %vm181_vm1, %v193_v46, 0.0 }
 0x138   :  { %v197_v50 = vpop.permute.xlu1 %196  ;;  %v205_v52 = vadd.f32 %v201_v47, %v165_v48 }
 0x139   :  { %v202_v51 = vsel %vm182_vm2, %v197_v50, 0.0 }
 0x13a   :  { %v206_v53 = vadd.f32 %v202_v51, %v166_v49 }
 0x13c   :  { %v208_v54 = vpack.c.bf16 %v206_v53, %v205_v52 }
 0x13f   :  { %470 = vmatmul.msk.bf16.gmra.mxu2 %vm343_vm10, %v208_v54 }
 0x1b2   :  { %v359_v41 = vpop.f32.mrf.mxu2 }
 0x1b3   :  { %v360_v58 = vadd.f32 %v518_v57, %v359_v41 }
 0x1b5   :  { %v369_v61 = vmax.f32 %v360_v58, 0.0 }
 0x1ba   :  { %v361_v59 = vpop.f32.mrf.mxu2 }
 0x1bb   :  { %v362_v60 = vadd.f32 %v518_v57, %v361_v59 }
 0x1bd   :  { %v370_v62 = vmax.f32 %v362_v60, 0.0 }
 0x1bf   :  { %v373_v63 = vpack.c.bf16 %v370_v62, %v369_v61 }
 0x1c1   :  { %479 = vmatmul.msk.bf16.vlgmr.msra.gmra.mxu3 %vm343_vm10, %v373_v63 }
 0x1c2   :  { %v364_v0 = vpop.f32.mrf.mxu2 }
 0x1c3   :  { %v365_v1 = vadd.f32 %v518_v57, %v364_v0 }
 0x1c5   :  { %v371_v4 = vmax.f32 %v365_v1, 0.0 }
 0x1ca   :  { %v366_v2 = vpop.f32.mrf.mxu2 }
 0x1cb   :  { %v367_v3 = vadd.f32 %v518_v57, %v366_v2 }
 0x1cd   :  { %v372_v5 = vmax.f32 %v367_v3, 0.0 }
 0x1cf   :  { %v374_v6 = vpack.c.bf16 %v372_v5, %v371_v4 }
 0x1d1   :  { %480 = vmatmul.msk.bf16.gmra.mxu3 %vm343_vm10, %v374_v6 }
 0x244   :  { %v406_v7 = vpop.f32.mrf.mxu3 }
 0x24c   :  { %v408_v8 = vpop.f32.mrf.mxu3 }
 0x24d   :  { %v416_v12 = vpack.c.bf16 %v408_v8, %v406_v7 }
 0x254   :  { %v411_v9 = vpop.f32.mrf.mxu3 }
 0x25c   :  { %v413_v10 = vpop.f32.mrf.mxu3 }
 0x25d   :  { %v417_v11 = vpack.c.bf16 %v413_v10, %v411_v9 }
 0x25f   :  { %428 = vmatpush.bf16.msrb.mxu0 %v417_v11 }
 0x263   :  { %429 = vmatpush.bf16.msrb.mxu0 %v416_v12 }
 0x266   :  { %481 = vmatmul.msk.bf16.vlgmr.msrb.gmra.mxu0 %vm343_vm10, %v682_v33 }
 0x276   :  { %482 = vmatmul.msk.bf16.gmra.mxu0 %vm343_vm10, %v208_v54 }
 0x2e3   :  { %v431_v14 = vpop.f32.mrf.mxu0 }
 0x2e4   :  { %v432_v15 = vadd.f32 %v519_v13, %v431_v14 }
 0x2e6   :  { %441 = vst [vmem:[%s733_s9] sm:$0xff] %v432_v15 }
 0x2eb   :  { %v433_v16 = vpop.f32.mrf.mxu0 }
 0x2ec   :  { %v434_v17 = vadd.f32 %v519_v13, %v433_v16 }
 0x2ee   :  { %442 = vst [vmem:[%s733_s9 + $0x8] sm:$0xff] %v434_v17 }
 0x2f3   :  { %v436_v18 = vpop.f32.mrf.mxu0 }
 0x2f4   :  { %v437_v19 = vadd.f32 %v519_v13, %v436_v18 }
 0x2f6   :  { %443 = vst [vmem:[%s733_s9 + $0x10] sm:$0xff] %v437_v19 }
 0x2fb   :  { %v438_v20 = vpop.f32.mrf.mxu0 }
 0x2fc   :  { %v439_v21 = vadd.f32 %v519_v13, %v438_v20 }
 0x2fe   :  { %444 = vst [vmem:[%s733_s9 + $0x18] sm:$0xff] %v439_v21 }

// kernel: mlp_knn_gnn_featrec_forward.2
= control target key start
LH: loop header
LB: loop body
LE: loop exit
PB: predicated region body
PF: predicated region fallthrough
CT: control target
= control target key end

     0   :  { %vm50_vm0 = vcmask 130048   ;;  %vm302_vm1 = vcmask 7168   ;;  %vm315_vm3 = vcmask 261120   ;;  %vm352_vm13 = vcmask 15368   ;;  %s776_s2 = inlined_call_operand.vmem [shape: bf16[16,16], index: 2, kind: input, shape index: {}]   ;;  %s777_s1 = inlined_call_operand.vmem [shape: bf16[32,16], index: 1, kind: input, shape index: {}, may-alias: {0,1}]   ;;  %s778_s3 = inlined_call_operand.vmem [shape: f32[1,16], index: 3, kind: input, shape index: {}]   ;;  %s779_s0 = inlined_call_operand.vmem [shape: bf16[32,16], index: 0, kind: input, shape index: {}, may-alias: {0,1}]   ;;  %s780_s5 = inlined_call_operand.vmem [shape: f32[1,16], index: 5, kind: input, shape index: {}]   ;;  %s781_s4 = inlined_call_operand.vmem [shape: bf16[16,16], index: 4, kind: input, shape index: {}]   ;;  %s782_s6 = inlined_call_operand.vmem [shape: s32[32,4], index: 6, kind: output, shape index: {}]  }
   0x1   :  { %v500_v0 = vld [vmem:[%s776_s2] sm:$0xff]  ;;  %v499_v2 = vld [vmem:[%s777_s1 + $0x8] sm:$0xff] }
   0x2   :  { %v498_v1 = vld [vmem:[%s777_s1] sm:$0xff]  ;;  %64 = vmatpush.bf16.msra.mxu0 %v500_v0  ;;  %504 = vmatpush.bf16.msra.mxu2 %v500_v0  ;;  %v503_v4 = vld [vmem:[%s779_s0 + $0x8] sm:$0xff] }
   0x3   :  { %v502_v3 = vld [vmem:[%s779_s0] sm:$0xff] }
   0x4   :  { %v501_v5 = vld [vmem:[%s781_s4] sm:$0xff] }
   0x5   :  { %471 = vmatmul.msk.bf16.vlgmr.msra.gmra.mxu0 %vm50_vm0, %v498_v1  ;;  %472 = vmatmul.msk.bf16.vlgmr.msra.gmra.mxu2 %vm50_vm0, %v499_v2  ;;  %v566_v7 = vld [vmem:[%s778_s3] ss:$0 sm:$0xff] }
   0x6   :  { %146 = vmatpush.bf16.msrb.mxu2 %v500_v0  ;;  %107 = vmatpush.bf16.msra.mxu1 %v501_v5  ;;  %v567_v38 = vld [vmem:[%s780_s5] ss:$0 sm:$0xff] }
   0x7   :  { %177 = vmatpush.bf16.msra.mxu3 %v501_v5 }
  0x15   :  { %487 = vmatmul.msk.bf16.vlgmr.msrb.gmra.mxu2 %vm50_vm0, %v502_v3 }
  0x25   :  { %488 = vmatmul.msk.bf16.gmra.mxu2 %vm50_vm0, %v503_v4 }
  0x82   :  { %v66_v6 = vpop.f32.mrf.mxu0 }
  0x83   :  { %v67_v9 = vadd.f32 %v566_v7, %v66_v6 }
  0x85   :  { %v76_v12 = vmax.f32 %v67_v9, 0.0 }
  0x88   :  { %v71_v8 = vpop.f32.mrf.mxu2 }
  0x89   :  { %v72_v18 = vadd.f32 %v566_v7, %v71_v8  ;;  %v568_v8 = vmov 1.0  }
  0x8a   :  { %v68_v10 = vpop.f32.mrf.mxu0 }
  0x8b   :  { %v69_v11 = vadd.f32 %v566_v7, %v68_v10  ;;  %v78_v20 = vmax.f32 %v72_v18, 0.0 }
  0x8d   :  { %v77_v13 = vmax.f32 %v69_v11, 0.0 }
  0x8f   :  { %v80_v14 = vpack.c.bf16 %v77_v13, %v76_v12 }
  0x90   :  { %v73_v15 = vpop.f32.mrf.mxu2 }
  0x91   :  { %477 = vmatmul.msk.bf16.vlgmr.msra.gmra.mxu1 %vm50_vm0, %v80_v14  ;;  %v74_v16 = vadd.f32 %v566_v7, %v73_v15  ;;  %v288_v15 = vlaneseq }
  0x93   :  { %v79_v19 = vmax.f32 %v74_v16, 0.0  ;;  %v293_v16 = vshrl.u32 %v288_v15, 7 }
  0x95   :  { %v81_v21 = vpack.c.bf16 %v79_v19, %v78_v20  ;;  %303 = vst.msk [vmem:[%s782_s6] sm:$0xff] %vm302_vm1, %v293_v16  ;;  %v295_v18 = vadd.s32 16, %v293_v16  ;;  %v296_v19 = vadd.s32 24, %v293_v16  ;;  %v289_v20 = vand.u32 127, %v288_v15 }
  0x97   :  { %305 = vst.msk [vmem:[%s782_s6 + $0x10] sm:$0xff] %vm302_vm1, %v295_v18  ;;  %vm307_vm2 = vcmp.eq.s32.totalorder %v289_v20, %v293_v16  ;;  %vm309_vm5 = vcmp.eq.s32.totalorder %v289_v20, %v295_v18  ;;  %vm310_vm6 = vcmp.eq.s32.totalorder %v289_v20, %v296_v19 }
  0x98   :  { %v148_v17 = vpop.f32.mrf.mxu2  ;;  %306 = vst.msk [vmem:[%s782_s6 + $0x18] sm:$0xff] %vm302_vm1, %v296_v19 }
  0x99   :  { %v149_v22 = vadd.f32 %v566_v7, %v148_v17  ;;  %v294_v17 = vadd.s32 8, %v293_v16 }
  0x9b   :  { %v158_v25 = vmax.f32 %v149_v22, 0.0  ;;  %304 = vst.msk [vmem:[%s782_s6 + $0x8] sm:$0xff] %vm302_vm1, %v294_v17  ;;  %vm308_vm4 = vcmp.eq.s32.totalorder %v289_v20, %v294_v17 }
  0xa0   :  { %v150_v23 = vpop.f32.mrf.mxu2 }
  0xa1   :  { %v151_v24 = vadd.f32 %v566_v7, %v150_v23  ;;  %478 = vmatmul.msk.bf16.gmra.mxu1 %vm50_vm0, %v81_v21 }
  0xa3   :  { %v159_v26 = vmax.f32 %v151_v24, 0.0 }
  0xa5   :  { %v162_v27 = vpack.c.bf16 %v159_v26, %v158_v25 }
  0xa7   :  { %489 = vmatmul.msk.bf16.vlgmr.msra.gmra.mxu3 %vm50_vm0, %v162_v27 }
  0xa8   :  { %v153_v28 = vpop.f32.mrf.mxu2 }
  0xa9   :  { %v154_v29 = vadd.f32 %v566_v7, %v153_v28 }
  0xab   :  { %v160_v32 = vmax.f32 %v154_v29, 0.0 }
  0xb0   :  { %v155_v30 = vpop.f32.mrf.mxu2 }
  0xb1   :  { %v156_v31 = vadd.f32 %v566_v7, %v155_v30 }
  0xb3   :  { %v161_v33 = vmax.f32 %v156_v31, 0.0 }
  0xb5   :  { %v163_v34 = vpack.c.bf16 %v161_v33, %v160_v32 }
  0xb7   :  { %490 = vmatmul.msk.bf16.gmra.mxu3 %vm50_vm0, %v163_v34 }
 0x10e   :  { %v109_v35 = vpop.f32.mrf.mxu1 }
 0x10f   :  { %v110_v44 = vadd.f32 %v567_v38, %v109_v35 }
 0x111   :  { %v189_v51 = vpack.c.bf16 %v110_v44, %v110_v44 }
 0x113   :  { %v203_v57 = vunpack.c.l.b16 %v189_v51  ;;  %v240_v62 = vunpack.c.l.bf16 %v189_v51 }
 0x115   :  { %v244_v3 = vmul.f32 %v240_v62, %v240_v62 }
 0x116   :  { %v111_v36 = vpop.f32.mrf.mxu1 }
 0x117   :  { %v112_v41 = vadd.f32 %v567_v38, %v111_v36 }
 0x119   :  { %v190_v47 = vpack.c.bf16 %v112_v41, %v112_v41 }
 0x11b   :  { %v204_v55 = vunpack.c.l.b16 %v190_v47  ;;  %v241_v58 = vunpack.c.l.bf16 %v190_v47 }
 0x11d   :  { %v207_v61 = vpack.c.b16 %v204_v55, %v203_v57  ;;  %v245_v63 = vmul.f32 %v241_v58, %v241_v58 }
 0x11e   :  { %v114_v37 = vpop.f32.mrf.mxu1 }
 0x11f   :  { %v115_v39 = vadd.f32 %v567_v38, %v114_v37  ;;  %v216_v2 = vsel %vm50_vm0, %v207_v61, 0 }
 0x121   :  { %v191_v42 = vpack.c.bf16 %v115_v39, %v115_v39  ;;  %v664_v39 = vcvt.s32.f32 %v289_v20 }
 0x123   :  { %v205_v48 = vunpack.c.l.b16 %v191_v42  ;;  %v242_v52 = vunpack.c.l.bf16 %v191_v42 }
 0x125   :  { %v246_v59 = vmul.f32 %v242_v52, %v242_v52 }
 0x126   :  { %v116_v40 = vpop.f32.mrf.mxu1 }
 0x127   :  { %v117_v43 = vadd.f32 %v567_v38, %v116_v40 }
 0x129   :  { %v192_v45 = vpack.c.bf16 %v117_v43, %v117_v43 }
 0x12a   :  { %v179_v46 = vpop.f32.mrf.mxu3 }
 0x12b   :  { %v206_v49 = vunpack.c.l.b16 %v192_v45  ;;  %v243_v50 = vunpack.c.l.bf16 %v192_v45  ;;  %v180_v1 = vadd.f32 %v567_v38, %v179_v46 }
 0x12d   :  { %v247_v53 = vmul.f32 %v243_v50, %v243_v50  ;;  %v208_v54 = vpack.c.b16 %v206_v49, %v205_v48  ;;  %v193_v6 = vmul.f32 2.0, %v180_v1 }
 0x12f   :  { %493 = vmatpush.xpose.msk.msrb.mxu1 %vm50_vm0, %v247_v53  ;;  %v219_v56 = vsel %vm50_vm0, %v208_v54, 0 }
 0x130   :  { %227 = vmatpush.bf16.xpose.msrb.mxu0 %v219_v56 }
 0x132   :  { %v181_v60 = vpop.f32.mrf.mxu3 }
 0x133   :  { %494 = vmatpush.xpose.msk.msrb.mxu1 %vm50_vm0, %v246_v59  ;;  %v182_v0 = vadd.f32 %v567_v38, %v181_v60 }
 0x135   :  { %v194_v4 = vmul.f32 2.0, %v182_v0 }
 0x137   :  { %495 = vmatpush.xpose.msk.msrb.mxu1 %vm50_vm0, %v245_v63  ;;  %v197_v7 = vpack.c.bf16 %v194_v4, %v193_v6 }
 0x138   :  { %228 = vmatpush.bf16.xpose.msrb.mxu0 %v216_v2 }
 0x13a   :  { %v184_v5 = vpop.f32.mrf.mxu3 }
 0x13b   :  { %496 = vmatpush.xpose.msk.msrb.mxu1 %vm50_vm0, %v244_v3  ;;  %v185_v11 = vadd.f32 %v567_v38, %v184_v5 }
 0x13d   :  { %v195_v13 = vmul.f32 2.0, %v185_v11 }
 0x13e   :  { %497 = vmatmul.msk.f32.vlgmr.msrb.gmra.mxu1 %vm50_vm0, %v568_v8 }
 0x13f   :  { %491 = vmatmul.msk.bf16.vlgmr.msrb.gmra.mxu0 %vm50_vm0, %v197_v7 }
 0x142   :  { %v186_v9 = vpop.f32.mrf.mxu3 }
 0x143   :  { %v187_v10 = vadd.f32 %v567_v38, %v186_v9 }
 0x145   :  { %v196_v12 = vmul.f32 2.0, %v187_v10 }
 0x147   :  { %v198_v14 = vpack.c.bf16 %v196_v12, %v195_v13 }
 0x14f   :  { %492 = vmatmul.msk.bf16.gmra.mxu0 %vm50_vm0, %v198_v14 }
 0x1bb   :  { %v280_v21 = vpop.f32.mrf.mxu1 }
 0x1bc   :  { %v283_v22 = vperm.slane %v280_v21, 0  ;;  %v230_v23 = vpop.f32.mrf.mxu0 }
 0x1be   :  { %v284_v24 = vsub.f32 %v230_v23, %v283_v22 }
 0x1c0   :  { %v311_v25 = vsel %vm307_vm2, -inf, %v284_v24 }
 0x1c1   :  { %v316_v26 = vsel %vm315_vm3, %v311_v25, -inf }
 0x1c2   :  { %317 = vmax.xlane.f32.xlu0 %v316_v26 }
 0x1c4   :  { %v232_v27 = vpop.f32.mrf.mxu0 }
 0x1c5   :  { %v285_v28 = vsub.f32 %v232_v27, %v283_v22 }
 0x1c7   :  { %v312_v29 = vsel %vm308_vm4, -inf, %v285_v28 }
 0x1c8   :  { %v319_v30 = vsel %vm315_vm3, %v312_v29, -inf }
 0x1ca   :  { %320 = vmax.xlane.f32.xlu0 %v319_v30 }
 0x1cc   :  { %v235_v31 = vpop.f32.mrf.mxu0 }
 0x1cd   :  { %v286_v32 = vsub.f32 %v235_v31, %v283_v22 }
 0x1cf   :  { %v313_v33 = vsel %vm309_vm5, -inf, %v286_v32 }
 0x1d0   :  { %v322_v34 = vsel %vm315_vm3, %v313_v33, -inf }
 0x1d1   :  { %323 = vmax.xlane.f32.xlu1 %v322_v34 }
 0x1d4   :  { %v237_v35 = vpop.f32.mrf.mxu0 }
 0x1d5   :  { %v287_v36 = vsub.f32 %v237_v35, %v283_v22 }
 0x1d7   :  { %v660_v37 = vsel %vm310_vm6, -inf, %v287_v36 }
 0x1d8   :  { %v325_v38 = vsel %vm315_vm3, %v660_v37, -inf }
 0x1d9   :  { %326 = vmax.xlane.f32.xlu1 %v325_v38 }
 0x235   :  { %v318_v40 = vpop.xlane.xlu0 %317 }
 0x236   :  { %vm328_vm7 = vcmp.eq.f32.partialorder %v311_v25, %v318_v40 }
 0x237   :  { %v332_v41 = vsel %vm328_vm7, %v664_v39, 32.0 }
 0x238   :  { %v336_v42 = vsel %vm315_vm3, %v332_v41, inf }
 0x239   :  { %337 = vmin.xlane.f32.xlu2 %v336_v42 }
 0x23d   :  { %v321_v43 = vpop.xlane.xlu0 %320 }
 0x23e   :  { %vm329_vm8 = vcmp.eq.f32.partialorder %v312_v29, %v321_v43 }
 0x23f   :  { %v333_v44 = vsel %vm329_vm8, %v664_v39, 32.0 }
 0x240   :  { %v339_v45 = vsel %vm315_vm3, %v333_v44, inf }
 0x241   :  { %340 = vmin.xlane.f32.xlu2 %v339_v45 }
 0x244   :  { %v324_v46 = vpop.xlane.xlu1 %323 }
 0x245   :  { %vm330_vm9 = vcmp.eq.f32.partialorder %v313_v33, %v324_v46 }
 0x246   :  { %v334_v47 = vsel %vm330_vm9, %v664_v39, 32.0 }
 0x247   :  { %v342_v48 = vsel %vm315_vm3, %v334_v47, inf }
 0x248   :  { %343 = vmin.xlane.f32.xlu0 %v342_v48 }
 0x24c   :  { %v327_v49 = vpop.xlane.xlu1 %326 }
 0x24d   :  { %vm331_vm10 = vcmp.eq.f32.partialorder %v660_v37, %v327_v49 }
 0x24e   :  { %v335_v50 = vsel %vm331_vm10, %v664_v39, 32.0 }
 0x24f   :  { %v345_v51 = vsel %vm315_vm3, %v335_v50, inf }
 0x250   :  { %346 = vmin.xlane.f32.xlu1 %v345_v51 }
 0x2ac   :  { %v338_v52 = vpop.xlane.xlu2 %337 }
 0x2ad   :  { %vm505_vm11 = vcmp.lt.s32.totalorder %v338_v52, 0  ;;  %v506_v53 = vceil.f32 %v338_v52  ;;  %v507_v54 = vfloor.f32 %v338_v52  ;;  %vm357_vm12 = vcmp.eq.f32.partialorder %v664_v39, %v338_v52 }
 0x2ae   :  { %v676_v55 = vsel %vm357_vm12, -inf, %v311_v25 }
 0x2af   :  { %v508_v56 = vsel %vm505_vm11, %v506_v53, %v507_v54  ;;  %v365_v57 = vsel %vm315_vm3, %v676_v55, -inf  ;;  %vm401_vm11 = vcmask 23568  }
 0x2b0   :  { %v509_v58 = vcvt.f32.s32 %v508_v56  ;;  %366 = vmax.xlane.f32.xlu2 %v365_v57 }
 0x2b2   :  { %353 = vst.msk [vmem:[%s782_s6] sm:$0xff] %vm352_vm13, %v509_v58 }
 0x2b4   :  { %v341_v59 = vpop.xlane.xlu2 %340 }
 0x2b5   :  { %vm510_vm14 = vcmp.lt.s32.totalorder %v341_v59, 0  ;;  %v511_v60 = vceil.f32 %v341_v59  ;;  %v512_v61 = vfloor.f32 %v341_v59  ;;  %vm358_vm15 = vcmp.eq.f32.partialorder %v664_v39, %v341_v59 }
 0x2b6   :  { %v685_v62 = vsel %vm358_vm15, -inf, %v312_v29 }
 0x2b7   :  { %v513_v63 = vsel %vm510_vm14, %v511_v60, %v512_v61  ;;  %v368_v0 = vsel %vm315_vm3, %v685_v62, -inf }
 0x2b8   :  { %v514_v1 = vcvt.f32.s32 %v513_v63  ;;  %369 = vmax.xlane.f32.xlu0 %v368_v0 }
 0x2ba   :  { %354 = vst.msk [vmem:[%s782_s6 + $0x8] sm:$0xff] %vm352_vm13, %v514_v1 }
 0x2bb   :  { %v344_v2 = vpop.xlane.xlu0 %343 }
 0x2bc   :  { %vm515_vm0 = vcmp.lt.s32.totalorder %v344_v2, 0  ;;  %v516_v3 = vceil.f32 %v344_v2  ;;  %v517_v4 = vfloor.f32 %v344_v2  ;;  %vm359_vm1 = vcmp.eq.f32.partialorder %v664_v39, %v344_v2 }
 0x2bd   :  { %v694_v5 = vsel %vm359_vm1, -inf, %v313_v33 }
 0x2be   :  { %v518_v6 = vsel %vm515_vm0, %v516_v3, %v517_v4  ;;  %v371_v7 = vsel %vm315_vm3, %v694_v5, -inf }
 0x2bf   :  { %v519_v8 = vcvt.f32.s32 %v518_v6  ;;  %372 = vmax.xlane.f32.xlu1 %v371_v7 }
 0x2c1   :  { %355 = vst.msk [vmem:[%s782_s6 + $0x10] sm:$0xff] %vm352_vm13, %v519_v8 }
 0x2c3   :  { %v347_v9 = vpop.xlane.xlu1 %346 }
 0x2c4   :  { %vm520_vm2 = vcmp.lt.s32.totalorder %v347_v9, 0  ;;  %v521_v10 = vceil.f32 %v347_v9  ;;  %v522_v11 = vfloor.f32 %v347_v9  ;;  %vm360_vm4 = vcmp.eq.f32.partialorder %v664_v39, %v347_v9 }
 0x2c5   :  { %v704_v12 = vsel %vm360_vm4, -inf, %v660_v37 }
 0x2c6   :  { %v523_v13 = vsel %vm520_vm2, %v521_v10, %v522_v11  ;;  %v374_v14 = vsel %vm315_vm3, %v704_v12, -inf }
 0x2c7   :  { %v524_v15 = vcvt.f32.s32 %v523_v13  ;;  %375 = vmax.xlane.f32.xlu2 %v374_v14 }
 0x2c9   :  { %356 = vst.msk [vmem:[%s782_s6 + $0x18] sm:$0xff] %vm352_vm13, %v524_v15 }
 0x323   :  { %v367_v16 = vpop.xlane.xlu2 %366 }
 0x324   :  { %vm377_vm5 = vcmp.eq.f32.partialorder %v676_v55, %v367_v16 }
 0x325   :  { %v381_v17 = vsel %vm377_vm5, %v664_v39, 32.0 }
 0x326   :  { %v385_v18 = vsel %vm315_vm3, %v381_v17, inf }
 0x327   :  { %386 = vmin.xlane.f32.xlu0 %v385_v18 }
 0x32b   :  { %v370_v19 = vpop.xlane.xlu0 %369 }
 0x32c   :  { %vm378_vm6 = vcmp.eq.f32.partialorder %v685_v62, %v370_v19 }
 0x32d   :  { %v382_v20 = vsel %vm378_vm6, %v664_v39, 32.0 }
 0x32e   :  { %v388_v21 = vsel %vm315_vm3, %v382_v20, inf }
 0x32f   :  { %389 = vmin.xlane.f32.xlu1 %v388_v21 }
 0x332   :  { %v373_v22 = vpop.xlane.xlu1 %372 }
 0x333   :  { %vm379_vm7 = vcmp.eq.f32.partialorder %v694_v5, %v373_v22 }
 0x334   :  { %v383_v23 = vsel %vm379_vm7, %v664_v39, 32.0 }
 0x335   :  { %v391_v24 = vsel %vm315_vm3, %v383_v23, inf }
 0x336   :  { %392 = vmin.xlane.f32.xlu2 %v391_v24 }
 0x33a   :  { %v376_v25 = vpop.xlane.xlu2 %375 }
 0x33b   :  { %vm380_vm8 = vcmp.eq.f32.partialorder %v704_v12, %v376_v25 }
 0x33c   :  { %v384_v26 = vsel %vm380_vm8, %v664_v39, 32.0  ;;  %vm450_vm8 = vcmask 31768  }
 0x33d   :  { %v394_v27 = vsel %vm315_vm3, %v384_v26, inf }
 0x33e   :  { %395 = vmin.xlane.f32.xlu0 %v394_v27 }
 0x39a   :  { %v387_v28 = vpop.xlane.xlu0 %386 }
 0x39b   :  { %vm525_vm9 = vcmp.lt.s32.totalorder %v387_v28, 0  ;;  %v526_v29 = vceil.f32 %v387_v28  ;;  %v527_v30 = vfloor.f32 %v387_v28  ;;  %vm406_vm10 = vcmp.eq.f32.partialorder %v664_v39, %v387_v28 }
 0x39c   :  { %v410_v31 = vsel %vm406_vm10, -inf, %v676_v55 }
 0x39d   :  { %v528_v32 = vsel %vm525_vm9, %v526_v29, %v527_v30  ;;  %v414_v33 = vsel %vm315_vm3, %v410_v31, -inf }
 0x39e   :  { %v529_v34 = vcvt.f32.s32 %v528_v32  ;;  %415 = vmax.xlane.f32.xlu1 %v414_v33 }
 0x3a0   :  { %402 = vst.msk [vmem:[%s782_s6] sm:$0xff] %vm401_vm11, %v529_v34 }
 0x3a2   :  { %v390_v35 = vpop.xlane.xlu1 %389 }
 0x3a3   :  { %vm530_vm12 = vcmp.lt.s32.totalorder %v390_v35, 0  ;;  %v531_v36 = vceil.f32 %v390_v35  ;;  %v532_v37 = vfloor.f32 %v390_v35  ;;  %vm407_vm13 = vcmp.eq.f32.partialorder %v664_v39, %v390_v35 }
 0x3a4   :  { %v411_v38 = vsel %vm407_vm13, -inf, %v685_v62 }
 0x3a5   :  { %v533_v40 = vsel %vm530_vm12, %v531_v36, %v532_v37  ;;  %v417_v41 = vsel %vm315_vm3, %v411_v38, -inf }
 0x3a6   :  { %v534_v42 = vcvt.f32.s32 %v533_v40  ;;  %418 = vmax.xlane.f32.xlu2 %v417_v41 }
 0x3a8   :  { %403 = vst.msk [vmem:[%s782_s6 + $0x8] sm:$0xff] %vm401_vm11, %v534_v42 }
 0x3a9   :  { %v393_v43 = vpop.xlane.xlu2 %392 }
 0x3aa   :  { %vm535_vm14 = vcmp.lt.s32.totalorder %v393_v43, 0  ;;  %v536_v44 = vceil.f32 %v393_v43  ;;  %v537_v45 = vfloor.f32 %v393_v43  ;;  %vm408_vm15 = vcmp.eq.f32.partialorder %v664_v39, %v393_v43 }
 0x3ab   :  { %v412_v46 = vsel %vm408_vm15, -inf, %v694_v5 }
 0x3ac   :  { %v538_v47 = vsel %vm535_vm14, %v536_v44, %v537_v45  ;;  %v420_v48 = vsel %vm315_vm3, %v412_v46, -inf }
 0x3ad   :  { %v539_v49 = vcvt.f32.s32 %v538_v47  ;;  %421 = vmax.xlane.f32.xlu0 %v420_v48 }
 0x3af   :  { %404 = vst.msk [vmem:[%s782_s6 + $0x10] sm:$0xff] %vm401_vm11, %v539_v49 }
 0x3b1   :  { %v396_v50 = vpop.xlane.xlu0 %395 }
 0x3b2   :  { %vm540_vm0 = vcmp.lt.s32.totalorder %v396_v50, 0  ;;  %v541_v51 = vceil.f32 %v396_v50  ;;  %v542_v52 = vfloor.f32 %v396_v50  ;;  %vm409_vm1 = vcmp.eq.f32.partialorder %v664_v39, %v396_v50 }
 0x3b3   :  { %v413_v53 = vsel %vm409_vm1, -inf, %v704_v12 }
 0x3b4   :  { %v543_v54 = vsel %vm540_vm0, %v541_v51, %v542_v52  ;;  %v423_v55 = vsel %vm315_vm3, %v413_v53, -inf }
 0x3b5   :  { %v544_v56 = vcvt.f32.s32 %v543_v54  ;;  %424 = vmax.xlane.f32.xlu1 %v423_v55 }
 0x3b7   :  { %405 = vst.msk [vmem:[%s782_s6 + $0x18] sm:$0xff] %vm401_vm11, %v544_v56 }
 0x411   :  { %v416_v57 = vpop.xlane.xlu1 %415 }
 0x412   :  { %vm426_vm2 = vcmp.eq.f32.partialorder %v410_v31, %v416_v57 }
 0x413   :  { %v430_v58 = vsel %vm426_vm2, %v664_v39, 32.0 }
 0x414   :  { %v434_v59 = vsel %vm315_vm3, %v430_v58, inf }
 0x415   :  { %435 = vmin.xlane.f32.xlu2 %v434_v59 }
 0x419   :  { %v419_v60 = vpop.xlane.xlu2 %418 }
 0x41a   :  { %vm427_vm4 = vcmp.eq.f32.partialorder %v411_v38, %v419_v60 }
 0x41b   :  { %v431_v61 = vsel %vm427_vm4, %v664_v39, 32.0 }
 0x41c   :  { %v437_v62 = vsel %vm315_vm3, %v431_v61, inf }
 0x41d   :  { %438 = vmin.xlane.f32.xlu0 %v437_v62 }
 0x420   :  { %v422_v63 = vpop.xlane.xlu0 %421 }
 0x421   :  { %vm428_vm5 = vcmp.eq.f32.partialorder %v412_v46, %v422_v63 }
 0x422   :  { %v432_v0 = vsel %vm428_vm5, %v664_v39, 32.0 }
 0x423   :  { %v440_v1 = vsel %vm315_vm3, %v432_v0, inf }
 0x424   :  { %441 = vmin.xlane.f32.xlu1 %v440_v1 }
 0x428   :  { %v425_v2 = vpop.xlane.xlu1 %424 }
 0x429   :  { %vm429_vm6 = vcmp.eq.f32.partialorder %v413_v53, %v425_v2 }
 0x42a   :  { %v433_v3 = vsel %vm429_vm6, %v664_v39, 32.0 }
 0x42b   :  { %v443_v4 = vsel %vm315_vm3, %v433_v3, inf }
 0x42c   :  { %444 = vmin.xlane.f32.xlu2 %v443_v4 }
 0x488   :  { %v436_v5 = vpop.xlane.xlu2 %435 }
 0x489   :  { %vm545_vm7 = vcmp.lt.s32.totalorder %v436_v5, 0  ;;  %v546_v6 = vceil.f32 %v436_v5  ;;  %v547_v7 = vfloor.f32 %v436_v5 }
 0x48b   :  { %v548_v8 = vsel %vm545_vm7, %v546_v6, %v547_v7 }
 0x48c   :  { %v549_v9 = vcvt.f32.s32 %v548_v8 }
 0x48e   :  { %451 = vst.msk [vmem:[%s782_s6] sm:$0xff] %vm450_vm8, %v549_v9 }
 0x490   :  { %v439_v10 = vpop.xlane.xlu0 %438 }
 0x491   :  { %vm550_vm9 = vcmp.lt.s32.totalorder %v439_v10, 0  ;;  %v551_v11 = vceil.f32 %v439_v10  ;;  %v552_v12 = vfloor.f32 %v439_v10 }
 0x493   :  { %v553_v39 = vsel %vm550_vm9, %v551_v11, %v552_v12 }
 0x494   :  { %v554_v13 = vcvt.f32.s32 %v553_v39 }
 0x496   :  { %452 = vst.msk [vmem:[%s782_s6 + $0x8] sm:$0xff] %vm450_vm8, %v554_v13 }
 0x497   :  { %v442_v14 = vpop.xlane.xlu1 %441 }
 0x498   :  { %vm555_vm3 = vcmp.lt.s32.totalorder %v442_v14, 0  ;;  %v556_v15 = vceil.f32 %v442_v14  ;;  %v557_v16 = vfloor.f32 %v442_v14 }
 0x49a   :  { %v558_v17 = vsel %vm555_vm3, %v556_v15, %v557_v16 }
 0x49b   :  { %v559_v18 = vcvt.f32.s32 %v558_v17 }
 0x49d   :  { %453 = vst.msk [vmem:[%s782_s6 + $0x10] sm:$0xff] %vm450_vm8, %v559_v18 }
 0x49f   :  { %v445_v19 = vpop.xlane.xlu2 %444 }
 0x4a0   :  { %vm560_vm10 = vcmp.lt.s32.totalorder %v445_v19, 0  ;;  %v561_v20 = vceil.f32 %v445_v19  ;;  %v562_v21 = vfloor.f32 %v445_v19 }
 0x4a2   :  { %v563_v22 = vsel %vm560_vm10, %v561_v20, %v562_v21 }
 0x4a3   :  { %v564_v23 = vcvt.f32.s32 %v563_v22 }
 0x4a5   :  { %454 = vst.msk [vmem:[%s782_s6 + $0x18] sm:$0xff] %vm450_vm8, %v564_v23 }

</bundles_post_ra>
